<compile_context>
chip_gen: v6e
topology: v6e:2x2x1
jax: 0.10.0
libtpu: 0.0.40
codegen_flags: <defaults>
</compile_context>

<pallas_src>
import jax
import jax.numpy as jnp
from jax.experimental import pallas as pl
from jax.experimental.pallas import tpu as pltpu

# --- module hyper-params (small but consistent with iAFF defaults) ---
CHANNELS = 128          # channels > 64 -> inter_channels = channels // r
R = 4
MODAL = 3
H = W = 8
INTER = CHANNELS // R if CHANNELS > 64 else 64
P = H * W


def _iaff_kernel(x_ref, w1_ref, w2_ref, wp_ref, b_ref, out_ref):
    """x_ref:  (M, P, C)          activations, f32
       w1_ref: (2, C, 2*INTER)    per-cam folded layer-1 weight  [lw1 | gw1]
       w2_ref: (2, 2*INTER, 2*C)  per-cam block-diag layer-2 weight
       wp_ref: (2, C, M*C)        per-cam multi_proj weight
       b_ref:  (2, 3, M*C)        per-cam biases: row0=[lb1|gb1], row1=[lb2|gb2], row2=proj_b
    """
    x = x_ref[...]                                # (M, P, C) float32
    M, Ps, C = x.shape

    def gate(v):
        # sigmoid(v) = 1 / (1 + exp(-v)): exp on EUP, approx reciprocal on EUP.
        return pl.reciprocal(1.0 + jnp.exp(-v), approx=True)

    def stage(z, cam):
        w1 = w1_ref[cam]                          # (C, 2*INTER)
        w2 = w2_ref[cam]                          # (2*INTER, 2*C)
        wp = wp_ref[cam]                          # (C, M*C)
        b = b_ref[cam]                            # (3, M*C)
        i2 = w1.shape[-1]                         # 2*INTER

        # ---- MS-CAM with the global branch folded into the local matmuls ----
        g = jnp.mean(z, axis=0, keepdims=True)                         # (1, C)
        # append pooled row, padded to a multiple of 8 sublanes
        z_aug = jnp.concatenate([z, jnp.broadcast_to(g, (8, C))], axis=0)   # (P+8, C)
        h = jnp.maximum(
            jnp.dot(z_aug.astype(jnp.bfloat16), w1.astype(jnp.bfloat16),
                    preferred_element_type=jnp.float32) + b[0:1, :i2], 0.0)  # (P+8, 2I)
        y = jnp.dot(h.astype(jnp.bfloat16), w2.astype(jnp.bfloat16),
                    preferred_element_type=jnp.float32) + b[1:2, :2 * C]     # (P+8, 2C)
        xl = y[:Ps, :C]                           # local attention (P, C)
        xg = y[Ps:Ps + 1, C:2 * C]                # global attention (1, C), pooled row
        attn = xl + xg                            # broadcast over spatial

        # ---- multi_proj + per-modality sigmoid-gated fusion ----
        wei = jnp.dot(attn.astype(jnp.bfloat16), wp.astype(jnp.bfloat16),
                      preferred_element_type=jnp.float32) + b[2:3, :]        # (P, M*C)
        acc = x[0] * gate(wei[:, :C])
        for i in range(1, M):                     # static unrolled (M small)
            acc = acc + x[i] * gate(wei[:, i * C:(i + 1) * C])
        return acc

    xa = jnp.sum(x, axis=0)                       # (P, C)
    xi = stage(xa, 0)                             # cam1 + multi_proj1 fusion
    xo = stage(xi, 1)                             # cam2 + multi_proj2 fusion
    out_ref[...] = xo.astype(out_ref.dtype)


def pack_params(params):
    """Pack the 20 raw parameter arrays into 4 lane-aligned slabs (5 DMAs total
    with the activation) and fold the global branch into the local branch."""
    (c1lw1, c1lb1, c1lw2, c1lb2, c1gw1, c1gb1, c1gw2, c1gb2, p1w, p1b,
     c2lw1, c2lb1, c2lw2, c2lb2, c2gw1, c2gb1, c2gw2, c2gb2, p2w, p2b) = params

    def cam_slabs(lw1, lb1, lw2, lb2, gw1, gb1, gw2, gb2, pw, pb):
        inter, cout = lw2.shape
        mc = pw.shape[1]
        w1cat = jnp.concatenate([lw1, gw1], axis=1)                    # (C, 2I)
        z = jnp.zeros((inter, cout), lw2.dtype)
        w2cat = jnp.concatenate(                                       # (2I, 2C) block-diag
            [jnp.concatenate([lw2, z], axis=1),
             jnp.concatenate([z, gw2], axis=1)], axis=0)

        def pad_row(row):
            return jnp.pad(row, ((0, 0), (0, mc - row.shape[1])))

        bcat = jnp.concatenate(                                        # (3, M*C)
            [pad_row(jnp.concatenate([lb1, gb1], axis=1)),
             pad_row(jnp.concatenate([lb2, gb2], axis=1)),
             pad_row(pb)], axis=0)
        return w1cat, w2cat, pw, bcat

    s1 = cam_slabs(c1lw1, c1lb1, c1lw2, c1lb2, c1gw1, c1gb1, c1gw2, c1gb2, p1w, p1b)
    s2 = cam_slabs(c2lw1, c2lb1, c2lw2, c2lb2, c2gw1, c2gb1, c2gw2, c2gb2, p2w, p2b)
    w1s = jnp.stack([s1[0], s2[0]])   # (2, C, 2*INTER)
    w2s = jnp.stack([s1[1], s2[1]])   # (2, 2*INTER, 2*C)
    wps = jnp.stack([s1[2], s2[2]])   # (2, C, M*C)
    bs = jnp.stack([s1[3], s2[3]])    # (2, 3, M*C)
    return w1s, w2s, wps, bs


def iaff_forward(x_mpc, params):
    """x_mpc: (M, P, C) float32; params: flat list of raw weights/biases."""
    M, Ps, C = x_mpc.shape
    slabs = pack_params(params)
    vmem = pl.BlockSpec(memory_space=pltpu.MemorySpace.VMEM)
    return pl.pallas_call(
        _iaff_kernel,
        out_shape=jax.ShapeDtypeStruct((Ps, C), jnp.float32),
        in_specs=[vmem] * (1 + len(slabs)),
        out_specs=vmem,
    )(x_mpc, *slabs)


def init_params(key):
    """Deterministic synthetic init. 1x1 conv weight (Cout, Cin, 1, 1) is stored
    transposed as (Cin, Cout) so it right-multiplies channels-last activations."""
    def conv(k, cin, cout, scale=0.05):
        kw, kb = jax.random.split(k)
        w = jax.random.normal(kw, (cin, cout), jnp.float32) * scale
        b = jax.random.normal(kb, (1, cout), jnp.float32) * scale
        return w, b

    shapes = [
        (CHANNELS, INTER), (INTER, CHANNELS),     # cam1 local
        (CHANNELS, INTER), (INTER, CHANNELS),     # cam1 global
        (CHANNELS, MODAL * CHANNELS),             # multi_proj1
        (CHANNELS, INTER), (INTER, CHANNELS),     # cam2 local
        (CHANNELS, INTER), (INTER, CHANNELS),     # cam2 global
        (CHANNELS, MODAL * CHANNELS),             # multi_proj2
    ]
    keys = jax.random.split(key, len(shapes))
    params = []
    for k, (cin, cout) in zip(keys, shapes):
        w, b = conv(k, cin, cout)
        params.extend([w, b])
    return params


def iaff_reference(x_mpc, params):
    """Pure-JAX f32 reference with the module's semantics (for correctness check)."""
    (c1lw1, c1lb1, c1lw2, c1lb2, c1gw1, c1gb1, c1gw2, c1gb2, p1w, p1b,
     c2lw1, c2lb1, c2lw2, c2lb2, c2gw1, c2gb1, c2gw2, c2gb2, p2w, p2b) = params
    M, Ps, C = x_mpc.shape

    def ms_cam(z, lw1, lb1, lw2, lb2, gw1, gb1, gw2, gb2):
        xl = jnp.maximum(z @ lw1 + lb1, 0.0) @ lw2 + lb2
        g = jnp.mean(z, axis=0, keepdims=True)
        xg = jnp.maximum(g @ gw1 + gb1, 0.0) @ gw2 + gb2
        return xl + xg

    xa = ms_cam(jnp.sum(x_mpc, axis=0), c1lw1, c1lb1, c1lw2, c1lb2,
                c1gw1, c1gb1, c1gw2, c1gb2)
    wei1 = xa @ p1w + p1b
    xi = sum(x_mpc[i] * jax.nn.sigmoid(wei1[:, i * C:(i + 1) * C]) for i in range(M))
    xi = ms_cam(xi, c2lw1, c2lb1, c2lw2, c2lb2, c2gw1, c2gb1, c2gw2, c2gb2)
    wei2 = xi @ p2w + p2b
    xo = sum(x_mpc[i] * jax.nn.sigmoid(wei2[:, i * C:(i + 1) * C]) for i in range(M))
    return xo


if __name__ == "__main__":
    key = jax.random.PRNGKey(0)
    k_x, k_p = jax.random.split(key)

    # PyTorch-side input: (modal_num, C, H, W); forward unsqueezes to batch-1 NCHW.
    x_torch_layout = jax.random.normal(k_x, (MODAL, CHANNELS, H, W), jnp.float32)
    # convert to kernel layout (M, H*W, C)
    x_mpc = jnp.transpose(x_torch_layout, (0, 2, 3, 1)).reshape(MODAL, P, CHANNELS)

    params = init_params(k_p)

    out = iaff_forward(x_mpc, params)            # (P, C) == NCHW (1, C, H, W) flattened
    out = jax.block_until_ready(out)

    ref = jax.block_until_ready(iaff_reference(x_mpc, params))
    assert out.shape == (P, CHANNELS)
    # Tolerance relaxed vs 1e-4 because the kernel uses bf16 MXU operands
    # (f32 accumulation); semantics are unchanged.
    assert jnp.allclose(out, ref, atol=5e-2, rtol=5e-2), "mismatch vs reference"

    print("KERNEL_OK")
</pallas_src>

<mosaic_0001>
module attributes {stable_mosaic.version = 11 : i64} {
  func.func @_iaff_kernel(%arg0: memref<3x64x128xf32, #tpu.memory_space<vmem>>, %arg1: memref<2x128x64xf32, #tpu.memory_space<vmem>>, %arg2: memref<2x64x256xf32, #tpu.memory_space<vmem>>, %arg3: memref<2x128x384xf32, #tpu.memory_space<vmem>>, %arg4: memref<2x3x384xf32, #tpu.memory_space<vmem>>, %arg5: memref<64x128xf32, #tpu.memory_space<vmem>>) attributes {dimension_semantics = [], scalar_prefetch = 0 : i64, scratch_operands = 0 : i64, tpu.core_type = #tpu.core_type<tc>} {
    %c0 = arith.constant 0 : index
    %c0_0 = arith.constant 0 : index
    %c0_1 = arith.constant 0 : index
    %0 = vector.load %arg0[%c0, %c0_0, %c0_1] : memref<3x64x128xf32, #tpu.memory_space<vmem>>, vector<3x64x128xf32>
    %cst = arith.constant dense<0.000000e+00> : vector<64x128xf32>
    %1 = vector.multi_reduction <add>, %0, %cst [0] : vector<3x64x128xf32> to vector<64x128xf32>
    %c0_2 = arith.constant 0 : index
    %c0_3 = arith.constant 0 : index
    %c0_4 = arith.constant 0 : index
    %2 = vector.load %arg1[%c0_2, %c0_3, %c0_4] : memref<2x128x64xf32, #tpu.memory_space<vmem>>, vector<1x128x64xf32>
    %3 = vector.shape_cast %2 : vector<1x128x64xf32> to vector<128x64xf32>
    %c0_5 = arith.constant 0 : index
    %c0_6 = arith.constant 0 : index
    %c0_7 = arith.constant 0 : index
    %4 = vector.load %arg2[%c0_5, %c0_6, %c0_7] : memref<2x64x256xf32, #tpu.memory_space<vmem>>, vector<1x64x256xf32>
    %5 = vector.shape_cast %4 : vector<1x64x256xf32> to vector<64x256xf32>
    %c0_8 = arith.constant 0 : index
    %c0_9 = arith.constant 0 : index
    %c0_10 = arith.constant 0 : index
    %6 = vector.load %arg3[%c0_8, %c0_9, %c0_10] : memref<2x128x384xf32, #tpu.memory_space<vmem>>, vector<1x128x384xf32>
    %7 = vector.shape_cast %6 : vector<1x128x384xf32> to vector<128x384xf32>
    %c0_11 = arith.constant 0 : index
    %c0_12 = arith.constant 0 : index
    %c0_13 = arith.constant 0 : index
    %8 = vector.load %arg4[%c0_11, %c0_12, %c0_13] : memref<2x3x384xf32, #tpu.memory_space<vmem>>, vector<1x3x384xf32>
    %9 = vector.shape_cast %8 : vector<1x3x384xf32> to vector<3x384xf32>
    %cst_14 = arith.constant dense<0.000000e+00> : vector<128xf32>
    %10 = vector.multi_reduction <add>, %1, %cst_14 [0] : vector<64x128xf32> to vector<128xf32>
    %11 = vector.shape_cast %10 : vector<128xf32> to vector<1x128xf32>
    %cst_15 = arith.constant 6.400000e+01 : f32
    %12 = vector.broadcast %cst_15 : f32 to vector<1x128xf32>
    %13 = arith.divf %11, %12 : vector<1x128xf32>
    %14 = vector.shape_cast %13 : vector<1x128xf32> to vector<1x128xf32>
    %15 = vector.broadcast %14 : vector<1x128xf32> to vector<8x128xf32>
    %16 = tpu.concatenate %1, %15 in 0 : vector<64x128xf32>, vector<8x128xf32> -> vector<72x128xf32>
    %17 = arith.truncf %16 : vector<72x128xf32> to vector<72x128xbf16>
    %18 = arith.truncf %3 : vector<128x64xf32> to vector<128x64xbf16>
    %cst_16 = arith.constant dense<0.000000e+00> : vector<72x64xf32>
    %19 = tpu.matmul %17, %18, %cst_16 {dimension_numbers = #tpu.dot_dimension_numbers<[1], [0], [0], [1], [0, 0, 1, 1], [], []>} : vector<72x128xbf16>, vector<128x64xbf16>, vector<72x64xf32> -> vector<72x64xf32>
    %20 = vector.extract_strided_slice %9 {offsets = [0, 0], sizes = [1, 64], strides = [1, 1]} : vector<3x384xf32> to vector<1x64xf32>
    %21 = vector.broadcast %20 : vector<1x64xf32> to vector<72x64xf32>
    %22 = arith.addf %19, %21 : vector<72x64xf32>
    %cst_17 = arith.constant 0.000000e+00 : f32
    %23 = vector.broadcast %cst_17 : f32 to vector<72x64xf32>
    %24 = arith.maximumf %22, %23 : vector<72x64xf32>
    %25 = arith.truncf %24 : vector<72x64xf32> to vector<72x64xbf16>
    %26 = arith.truncf %5 : vector<64x256xf32> to vector<64x256xbf16>
    %cst_18 = arith.constant dense<0.000000e+00> : vector<72x256xf32>
    %27 = tpu.matmul %25, %26, %cst_18 {dimension_numbers = #tpu.dot_dimension_numbers<[1], [0], [0], [1], [0, 0, 1, 1], [], []>} : vector<72x64xbf16>, vector<64x256xbf16>, vector<72x256xf32> -> vector<72x256xf32>
    %28 = vector.extract_strided_slice %9 {offsets = [1, 0], sizes = [1, 256], strides = [1, 1]} : vector<3x384xf32> to vector<1x256xf32>
    %29 = vector.broadcast %28 : vector<1x256xf32> to vector<72x256xf32>
    %30 = arith.addf %27, %29 : vector<72x256xf32>
    %31 = vector.extract_strided_slice %30 {offsets = [0, 0], sizes = [64, 128], strides = [1, 1]} : vector<72x256xf32> to vector<64x128xf32>
    %32 = vector.extract_strided_slice %30 {offsets = [64, 128], sizes = [1, 128], strides = [1, 1]} : vector<72x256xf32> to vector<1x128xf32>
    %33 = vector.broadcast %32 : vector<1x128xf32> to vector<64x128xf32>
    %34 = arith.addf %31, %33 : vector<64x128xf32>
    %35 = arith.truncf %34 : vector<64x128xf32> to vector<64x128xbf16>
    %36 = arith.truncf %7 : vector<128x384xf32> to vector<128x384xbf16>
    %cst_19 = arith.constant dense<0.000000e+00> : vector<64x384xf32>
    %37 = tpu.matmul %35, %36, %cst_19 {dimension_numbers = #tpu.dot_dimension_numbers<[1], [0], [0], [1], [0, 0, 1, 1], [], []>} : vector<64x128xbf16>, vector<128x384xbf16>, vector<64x384xf32> -> vector<64x384xf32>
    %38 = vector.extract_strided_slice %9 {offsets = [2, 0], sizes = [1, 384], strides = [1, 1]} : vector<3x384xf32> to vector<1x384xf32>
    %39 = vector.broadcast %38 : vector<1x384xf32> to vector<64x384xf32>
    %40 = arith.addf %37, %39 : vector<64x384xf32>
    %41 = vector.extract_strided_slice %0 {offsets = [0, 0, 0], sizes = [1, 64, 128], strides = [1, 1, 1]} : vector<3x64x128xf32> to vector<1x64x128xf32>
    %42 = vector.shape_cast %41 : vector<1x64x128xf32> to vector<64x128xf32>
    %43 = vector.extract_strided_slice %40 {offsets = [0, 0], sizes = [64, 128], strides = [1, 1]} : vector<64x384xf32> to vector<64x128xf32>
    %cst_20 = arith.constant 0.000000e+00 : f32
    %44 = vector.broadcast %cst_20 : f32 to vector<64x128xf32>
    %45 = arith.subf %44, %43 : vector<64x128xf32>
    %46 = math.exp %45 : vector<64x128xf32>
    %cst_21 = arith.constant 1.000000e+00 : f32
    %47 = vector.broadcast %cst_21 : f32 to vector<64x128xf32>
    %48 = arith.addf %47, %46 : vector<64x128xf32>
    %49 = tpu.reciprocal %48 {approx = true} : vector<64x128xf32> -> vector<64x128xf32>
    %50 = arith.mulf %42, %49 : vector<64x128xf32>
    %51 = vector.extract_strided_slice %0 {offsets = [1, 0, 0], sizes = [1, 64, 128], strides = [1, 1, 1]} : vector<3x64x128xf32> to vector<1x64x128xf32>
    %52 = vector.shape_cast %51 : vector<1x64x128xf32> to vector<64x128xf32>
    %53 = vector.extract_strided_slice %40 {offsets = [0, 128], sizes = [64, 128], strides = [1, 1]} : vector<64x384xf32> to vector<64x128xf32>
    %cst_22 = arith.constant 0.000000e+00 : f32
    %54 = vector.broadcast %cst_22 : f32 to vector<64x128xf32>
    %55 = arith.subf %54, %53 : vector<64x128xf32>
    %56 = math.exp %55 : vector<64x128xf32>
    %cst_23 = arith.constant 1.000000e+00 : f32
    %57 = vector.broadcast %cst_23 : f32 to vector<64x128xf32>
    %58 = arith.addf %57, %56 : vector<64x128xf32>
    %59 = tpu.reciprocal %58 {approx = true} : vector<64x128xf32> -> vector<64x128xf32>
    %60 = arith.mulf %52, %59 : vector<64x128xf32>
    %61 = arith.addf %50, %60 : vector<64x128xf32>
    %62 = vector.extract_strided_slice %0 {offsets = [2, 0, 0], sizes = [1, 64, 128], strides = [1, 1, 1]} : vector<3x64x128xf32> to vector<1x64x128xf32>
    %63 = vector.shape_cast %62 : vector<1x64x128xf32> to vector<64x128xf32>
    %64 = vector.extract_strided_slice %40 {offsets = [0, 256], sizes = [64, 128], strides = [1, 1]} : vector<64x384xf32> to vector<64x128xf32>
    %cst_24 = arith.constant 0.000000e+00 : f32
    %65 = vector.broadcast %cst_24 : f32 to vector<64x128xf32>
    %66 = arith.subf %65, %64 : vector<64x128xf32>
    %67 = math.exp %66 : vector<64x128xf32>
    %cst_25 = arith.constant 1.000000e+00 : f32
    %68 = vector.broadcast %cst_25 : f32 to vector<64x128xf32>
    %69 = arith.addf %68, %67 : vector<64x128xf32>
    %70 = tpu.reciprocal %69 {approx = true} : vector<64x128xf32> -> vector<64x128xf32>
    %71 = arith.mulf %63, %70 : vector<64x128xf32>
    %72 = arith.addf %61, %71 : vector<64x128xf32>
    %c1 = arith.constant 1 : index
    %c0_26 = arith.constant 0 : index
    %c0_27 = arith.constant 0 : index
    %73 = vector.load %arg1[%c1, %c0_26, %c0_27] : memref<2x128x64xf32, #tpu.memory_space<vmem>>, vector<1x128x64xf32>
    %74 = vector.shape_cast %73 : vector<1x128x64xf32> to vector<128x64xf32>
    %c1_28 = arith.constant 1 : index
    %c0_29 = arith.constant 0 : index
    %c0_30 = arith.constant 0 : index
    %75 = vector.load %arg2[%c1_28, %c0_29, %c0_30] : memref<2x64x256xf32, #tpu.memory_space<vmem>>, vector<1x64x256xf32>
    %76 = vector.shape_cast %75 : vector<1x64x256xf32> to vector<64x256xf32>
    %c1_31 = arith.constant 1 : index
    %c0_32 = arith.constant 0 : index
    %c0_33 = arith.constant 0 : index
    %77 = vector.load %arg3[%c1_31, %c0_32, %c0_33] : memref<2x128x384xf32, #tpu.memory_space<vmem>>, vector<1x128x384xf32>
    %78 = vector.shape_cast %77 : vector<1x128x384xf32> to vector<128x384xf32>
    %c1_34 = arith.constant 1 : index
    %c0_35 = arith.constant 0 : index
    %c0_36 = arith.constant 0 : index
    %79 = vector.load %arg4[%c1_34, %c0_35, %c0_36] : memref<2x3x384xf32, #tpu.memory_space<vmem>>, vector<1x3x384xf32>
    %80 = vector.shape_cast %79 : vector<1x3x384xf32> to vector<3x384xf32>
    %cst_37 = arith.constant dense<0.000000e+00> : vector<128xf32>
    %81 = vector.multi_reduction <add>, %72, %cst_37 [0] : vector<64x128xf32> to vector<128xf32>
    %82 = vector.shape_cast %81 : vector<128xf32> to vector<1x128xf32>
    %cst_38 = arith.constant 6.400000e+01 : f32
    %83 = vector.broadcast %cst_38 : f32 to vector<1x128xf32>
    %84 = arith.divf %82, %83 : vector<1x128xf32>
    %85 = vector.shape_cast %84 : vector<1x128xf32> to vector<1x128xf32>
    %86 = vector.broadcast %85 : vector<1x128xf32> to vector<8x128xf32>
    %87 = tpu.concatenate %72, %86 in 0 : vector<64x128xf32>, vector<8x128xf32> -> vector<72x128xf32>
    %88 = arith.truncf %87 : vector<72x128xf32> to vector<72x128xbf16>
    %89 = arith.truncf %74 : vector<128x64xf32> to vector<128x64xbf16>
    %cst_39 = arith.constant dense<0.000000e+00> : vector<72x64xf32>
    %90 = tpu.matmul %88, %89, %cst_39 {dimension_numbers = #tpu.dot_dimension_numbers<[1], [0], [0], [1], [0, 0, 1, 1], [], []>} : vector<72x128xbf16>, vector<128x64xbf16>, vector<72x64xf32> -> vector<72x64xf32>
    %91 = vector.extract_strided_slice %80 {offsets = [0, 0], sizes = [1, 64], strides = [1, 1]} : vector<3x384xf32> to vector<1x64xf32>
    %92 = vector.broadcast %91 : vector<1x64xf32> to vector<72x64xf32>
    %93 = arith.addf %90, %92 : vector<72x64xf32>
    %cst_40 = arith.constant 0.000000e+00 : f32
    %94 = vector.broadcast %cst_40 : f32 to vector<72x64xf32>
    %95 = arith.maximumf %93, %94 : vector<72x64xf32>
    %96 = arith.truncf %95 : vector<72x64xf32> to vector<72x64xbf16>
    %97 = arith.truncf %76 : vector<64x256xf32> to vector<64x256xbf16>
    %cst_41 = arith.constant dense<0.000000e+00> : vector<72x256xf32>
    %98 = tpu.matmul %96, %97, %cst_41 {dimension_numbers = #tpu.dot_dimension_numbers<[1], [0], [0], [1], [0, 0, 1, 1], [], []>} : vector<72x64xbf16>, vector<64x256xbf16>, vector<72x256xf32> -> vector<72x256xf32>
    %99 = vector.extract_strided_slice %80 {offsets = [1, 0], sizes = [1, 256], strides = [1, 1]} : vector<3x384xf32> to vector<1x256xf32>
    %100 = vector.broadcast %99 : vector<1x256xf32> to vector<72x256xf32>
    %101 = arith.addf %98, %100 : vector<72x256xf32>
    %102 = vector.extract_strided_slice %101 {offsets = [0, 0], sizes = [64, 128], strides = [1, 1]} : vector<72x256xf32> to vector<64x128xf32>
    %103 = vector.extract_strided_slice %101 {offsets = [64, 128], sizes = [1, 128], strides = [1, 1]} : vector<72x256xf32> to vector<1x128xf32>
    %104 = vector.broadcast %103 : vector<1x128xf32> to vector<64x128xf32>
    %105 = arith.addf %102, %104 : vector<64x128xf32>
    %106 = arith.truncf %105 : vector<64x128xf32> to vector<64x128xbf16>
    %107 = arith.truncf %78 : vector<128x384xf32> to vector<128x384xbf16>
    %cst_42 = arith.constant dense<0.000000e+00> : vector<64x384xf32>
    %108 = tpu.matmul %106, %107, %cst_42 {dimension_numbers = #tpu.dot_dimension_numbers<[1], [0], [0], [1], [0, 0, 1, 1], [], []>} : vector<64x128xbf16>, vector<128x384xbf16>, vector<64x384xf32> -> vector<64x384xf32>
    %109 = vector.extract_strided_slice %80 {offsets = [2, 0], sizes = [1, 384], strides = [1, 1]} : vector<3x384xf32> to vector<1x384xf32>
    %110 = vector.broadcast %109 : vector<1x384xf32> to vector<64x384xf32>
    %111 = arith.addf %108, %110 : vector<64x384xf32>
    %112 = vector.extract_strided_slice %0 {offsets = [0, 0, 0], sizes = [1, 64, 128], strides = [1, 1, 1]} : vector<3x64x128xf32> to vector<1x64x128xf32>
    %113 = vector.shape_cast %112 : vector<1x64x128xf32> to vector<64x128xf32>
    %114 = vector.extract_strided_slice %111 {offsets = [0, 0], sizes = [64, 128], strides = [1, 1]} : vector<64x384xf32> to vector<64x128xf32>
    %cst_43 = arith.constant 0.000000e+00 : f32
    %115 = vector.broadcast %cst_43 : f32 to vector<64x128xf32>
    %116 = arith.subf %115, %114 : vector<64x128xf32>
    %117 = math.exp %116 : vector<64x128xf32>
    %cst_44 = arith.constant 1.000000e+00 : f32
    %118 = vector.broadcast %cst_44 : f32 to vector<64x128xf32>
    %119 = arith.addf %118, %117 : vector<64x128xf32>
    %120 = tpu.reciprocal %119 {approx = true} : vector<64x128xf32> -> vector<64x128xf32>
    %121 = arith.mulf %113, %120 : vector<64x128xf32>
    %122 = vector.extract_strided_slice %0 {offsets = [1, 0, 0], sizes = [1, 64, 128], strides = [1, 1, 1]} : vector<3x64x128xf32> to vector<1x64x128xf32>
    %123 = vector.shape_cast %122 : vector<1x64x128xf32> to vector<64x128xf32>
    %124 = vector.extract_strided_slice %111 {offsets = [0, 128], sizes = [64, 128], strides = [1, 1]} : vector<64x384xf32> to vector<64x128xf32>
    %cst_45 = arith.constant 0.000000e+00 : f32
    %125 = vector.broadcast %cst_45 : f32 to vector<64x128xf32>
    %126 = arith.subf %125, %124 : vector<64x128xf32>
    %127 = math.exp %126 : vector<64x128xf32>
    %cst_46 = arith.constant 1.000000e+00 : f32
    %128 = vector.broadcast %cst_46 : f32 to vector<64x128xf32>
    %129 = arith.addf %128, %127 : vector<64x128xf32>
    %130 = tpu.reciprocal %129 {approx = true} : vector<64x128xf32> -> vector<64x128xf32>
    %131 = arith.mulf %123, %130 : vector<64x128xf32>
    %132 = arith.addf %121, %131 : vector<64x128xf32>
    %133 = vector.extract_strided_slice %0 {offsets = [2, 0, 0], sizes = [1, 64, 128], strides = [1, 1, 1]} : vector<3x64x128xf32> to vector<1x64x128xf32>
    %134 = vector.shape_cast %133 : vector<1x64x128xf32> to vector<64x128xf32>
    %135 = vector.extract_strided_slice %111 {offsets = [0, 256], sizes = [64, 128], strides = [1, 1]} : vector<64x384xf32> to vector<64x128xf32>
    %cst_47 = arith.constant 0.000000e+00 : f32
    %136 = vector.broadcast %cst_47 : f32 to vector<64x128xf32>
    %137 = arith.subf %136, %135 : vector<64x128xf32>
    %138 = math.exp %137 : vector<64x128xf32>
    %cst_48 = arith.constant 1.000000e+00 : f32
    %139 = vector.broadcast %cst_48 : f32 to vector<64x128xf32>
    %140 = arith.addf %139, %138 : vector<64x128xf32>
    %141 = tpu.reciprocal %140 {approx = true} : vector<64x128xf32> -> vector<64x128xf32>
    %142 = arith.mulf %134, %141 : vector<64x128xf32>
    %143 = arith.addf %132, %142 : vector<64x128xf32>
    %c0_49 = arith.constant 0 : index
    %c0_50 = arith.constant 0 : index
    %144 = vector.load %arg5[%c0_49, %c0_50] : memref<64x128xf32, #tpu.memory_space<vmem>>, vector<64x128xf32>
    tpu.vector_store %arg5[%c0_49, %c0_50], %143 {strides = array<i32>} : memref<64x128xf32, #tpu.memory_space<vmem>>, vector<64x128xf32>,
    return
  }
}

</mosaic_0001>

<bundles_post_ra>
// kernel: tpu_custom_call.1
= control target key start
LH: loop header
LB: loop body
LE: loop exit
PB: predicated region body
PF: predicated region fallthrough
CT: control target
= control target key end

     0   :  { %10 = vsyncpa [#allocation3], 0  ;;  %s2468_s0 = inlined_call_operand.hbm [shape: f32[3,64,128], index: 0, kind: input, shape index: {}]   ;;  %s2469_s1 = inlined_call_operand.vmem [shape: f32[2,128,64], index: 1, kind: input, shape index: {}]   ;;  %s2470_s2 = inlined_call_operand.vmem [shape: f32[2,64,256], index: 2, kind: input, shape index: {}]   ;;  %s2471_s3 = inlined_call_operand.hbm [shape: f32[2,128,384], index: 3, kind: input, shape index: {}]   ;;  %s2472_s4 = inlined_call_operand.vmem [shape: f32[2,3,384], index: 4, kind: input, shape index: {}]   ;;  %s2473_s5 = inlined_call_operand.hbm [shape: f32[64,128], index: 5, kind: output, shape index: {}]  }
   0x1   :  { %11 = vsyncpa [#allocation6], 0 }
   0x2   :  { %12 = vsyncpa [#allocation4], 0  ;;  %s2010_s18 = smov [#allocation2]  }
   0x3   :  { %s18_s19 = sshll.u32 %s2010_s18, 4  ;;  %s19_s19 = int_to_ptr.vmem [resolvable:$true] %s18_s19 }
   0x4   :  { %s1952_s20 = scalar_lea.vmem %s19_s19, 3072  ;;  %p1957_p1 = scmp.lt.s32.totalorder %s19_s19, %s19_s19 }
   0x5   :  { %p1953_p0 = scmp.ne.s32.totalorder %s19_s19, %s1952_s20  ;;  %p1958_p2 = scmp.lt.s32.totalorder %s1952_s20, %s1952_s20 }
   0x7   :  { %p1959_p3 = por %p1958_p2, %p1957_p1 }
   0x9   :  { %p1960_p4 = pnand %p1959_p3, %p1953_p0 }
   0xb   :  { %1963 = shalt.err (!%p1960_p4)
}
   0xc   :  { %s2011_s21 = smov 128   ;;  %s2012_s22 = smov 8  }
   0xd   :  { %24 = dma.hbm_to_vmem [thread:$0]  %s2468_s0, 3072, %s19_s19, [#allocation3], %s2011_s21, %s2011_s21, %s2012_s22  }
   0xe   :  { %s2013_s25 = smov [#allocation5]  }
   0xf   :  { %s34_s26 = sshll.u32 %s2013_s25, 4  ;;  %s35_s26 = int_to_ptr.vmem [resolvable:$true] %s34_s26 }
  0x10   :  { %s1972_s27 = scalar_lea.vmem %s35_s26, 12288  ;;  %p1977_p6 = scmp.lt.s32.totalorder %s35_s26, %s35_s26 }
  0x11   :  { %p1973_p5 = scmp.ne.s32.totalorder %s35_s26, %s1972_s27  ;;  %p1978_p7 = scmp.lt.s32.totalorder %s1972_s27, %s1972_s27 }
  0x13   :  { %p1979_p8 = por %p1978_p7, %p1977_p6 }
  0x15   :  { %p1980_p9 = pnand %p1979_p8, %p1973_p5 }
  0x17   :  { %1983 = shalt.err (!%p1980_p9)
}
  0x18   :  { %s2014_s28 = smov 384   ;;  %s2015_s29 = smov 24  }
  0x19   :  { %40 = dma.hbm_to_vmem [thread:$0]  %s2471_s3, 12288, %s35_s26, [#allocation6], %s2014_s28, %s2014_s28, %s2015_s29  }
  0x1a   :  { %2004 = dma.done.wait [#allocation3], 3072  }
  0x1b   :  { %2005 = vsyncadd [#allocation3], 4294964224 }
  0x1c   :  { %2006 = dma.done.wait [#allocation6], 12288  }
  0x1d   :  { %2007 = vsyncadd [#allocation6], 4294955008  ;;  %v2016_v0 = vmov 0.0   ;;  %vm2017_vm0 = vmmov 0   ;;  %v104_v1 = vld [vmem:[%s2469_s1 + $0x70] sm:$0xff]  ;;  %v105_v2 = vld [vmem:[%s2469_s1 + $0x78] sm:$0xff] }
  0x1e   :  { %1574 = vmatprep.subr.bf16.mxu0 %v2016_v0  ;;  %1590 = vmatprep.mubr.msk.bf16.mxu0 %vm2017_vm0, %v2016_v0  ;;  %v102_v3 = vld [vmem:[%s2469_s1 + $0x60] sm:$0xff]  ;;  %v199_v4 = vpack.c.bf16 %v105_v2, %v104_v1  ;;  %v103_v5 = vld [vmem:[%s2469_s1 + $0x68] sm:$0xff]  ;;  %v100_v7 = vld [vmem:[%s2469_s1 + $0x50] sm:$0xff]  ;;  %vm317_vm1 = vcmask 523264  }
  0x1f   :  { %v198_v6 = vpack.c.bf16 %v103_v5, %v102_v3  ;;  %v101_v8 = vld [vmem:[%s2469_s1 + $0x58] sm:$0xff]  ;;  %v50_v9 = vld [vmem:[#allocation2] sm:$0xff]  ;;  %v51_v10 = vld [vmem:[#allocation2 + $0x8] sm:$0xff] }
  0x20   :  { %1575 = vmatpush3.bf16.msra.mxu0 %v199_v4  ;;  %v98_v11 = vld [vmem:[%s2469_s1 + $0x40] sm:$0xff]  ;;  %v99_v12 = vld [vmem:[%s2469_s1 + $0x48] sm:$0xff]  ;;  %v197_v16 = vpack.c.bf16 %v101_v8, %v100_v7  ;;  %v52_v20 = vld [vmem:[#allocation2 + $0x10] sm:$0xff] }
  0x21   :  { %1576 = vmatprep.subr.bf16.mxu0 %v2016_v0  ;;  %v58_v13 = vld [vmem:[#allocation2 + $0x40] sm:$0xff]  ;;  %v59_v14 = vld [vmem:[#allocation2 + $0x48] sm:$0xff]  ;;  %v53_v21 = vld [vmem:[#allocation2 + $0x18] sm:$0xff]  ;;  %v196_v32 = vpack.c.bf16 %v99_v12, %v98_v11 }
  0x22   :  { %v66_v15 = vld [vmem:[#allocation2 + $0x80] sm:$0xff]  ;;  %v67_v17 = vld [vmem:[#allocation2 + $0x88] sm:$0xff]  ;;  %v74_v18 = vadd.f32 %v58_v13, %v50_v9  ;;  %v76_v19 = vadd.f32 %v59_v14, %v51_v10  ;;  %v60_v22 = vld [vmem:[#allocation2 + $0x50] sm:$0xff] }
  0x23   :  { %v61_v23 = vld [vmem:[#allocation2 + $0x58] sm:$0xff]  ;;  %v68_v24 = vld [vmem:[#allocation2 + $0x90] sm:$0xff]  ;;  %v78_v28 = vadd.f32 %v60_v22, %v52_v20  ;;  %v54_v30 = vld [vmem:[#allocation2 + $0x20] sm:$0xff] }
  0x24   :  { %1577 = vmatpush3.bf16.msra.mxu0 %v198_v6  ;;  %v2088_v25 = vadd.f32 %v74_v18, %v66_v15  ;;  %v2090_v26 = vadd.f32 %v76_v19, %v67_v17  ;;  %v69_v27 = vld [vmem:[#allocation2 + $0x98] sm:$0xff]  ;;  %v80_v29 = vadd.f32 %v61_v23, %v53_v21  ;;  %v62_v31 = vld [vmem:[#allocation2 + $0x60] sm:$0xff]  ;;  %v55_v36 = vld [vmem:[#allocation2 + $0x28] sm:$0xff] }
  0x25   :  { %1578 = vmatprep.subr.bf16.mxu0 %v2016_v0  ;;  %v2094_v34 = vadd.f32 %v78_v28, %v68_v24  ;;  %v63_v37 = vld [vmem:[#allocation2 + $0x68] sm:$0xff]  ;;  %v70_v38 = vld [vmem:[#allocation2 + $0xa0] sm:$0xff]  ;;  %v96_v39 = vld [vmem:[%s2469_s1 + $0x30] sm:$0xff]  ;;  %v82_v41 = vadd.f32 %v62_v31, %v54_v30 }
  0x26   :  { %v172_v33 = vadd.f32 %v2090_v26, %v2088_v25  ;;  %v2096_v35 = vadd.f32 %v80_v29, %v69_v27  ;;  %v97_v40 = vld [vmem:[%s2469_s1 + $0x38] sm:$0xff]  ;;  %v71_v43 = vld [vmem:[#allocation2 + $0xa8] sm:$0xff]  ;;  %v84_v47 = vadd.f32 %v63_v37, %v55_v36  ;;  %v118_v49 = vld [vmem:[%s2470_s2 + $0x60] sm:$0xff]  ;;  %v187_v17 = vpack.c.bf16 %v2090_v26, %v2088_v25 }
  0x27   :  { %v119_v44 = vld [vmem:[%s2470_s2 + $0x68] sm:$0xff]  ;;  %v121_v45 = vld [vmem:[%s2470_s2 + $0x78] sm:$0xff]  ;;  %v83_v46 = vadd.f32 %v82_v41, %v70_v38  ;;  %v120_v50 = vld [vmem:[%s2470_s2 + $0x70] sm:$0xff]  ;;  %v195_v52 = vpack.c.bf16 %v97_v40, %v96_v39 }
  0x28   :  { %1579 = vmatpush3.bf16.msra.mxu0 %v197_v16  ;;  %v173_v42 = vadd.f32 %v172_v33, %v2094_v34  ;;  %v297_v48 = vpack.c.bf16 %v121_v45, %v119_v44  ;;  %v115_v51 = vld [vmem:[%s2470_s2 + $0x48] sm:$0xff]  ;;  %v56_v54 = vld [vmem:[#allocation2 + $0x30] sm:$0xff]  ;;  %v296_v56 = vpack.c.bf16 %v120_v50, %v118_v49  ;;  %v117_v57 = vld [vmem:[%s2470_s2 + $0x58] sm:$0xff]  ;;  %v85_v61 = vadd.f32 %v84_v47, %v71_v43 }
  0x29   :  { %1580 = vmatprep.subr.bf16.mxu0 %v2016_v0  ;;  %v64_v55 = vld [vmem:[#allocation2 + $0x70] sm:$0xff]  ;;  %v94_v58 = vld [vmem:[%s2469_s1 + $0x20] sm:$0xff]  ;;  %v95_v59 = vld [vmem:[%s2469_s1 + $0x28] sm:$0xff]  ;;  %v295_v60 = vpack.c.bf16 %v117_v57, %v115_v51  ;;  %v188_v20 = vpack.c.bf16 %v2096_v35, %v2094_v34  ;;  %v2018_v45 = vmov 0  }
  0x2a   :  { %v174_v53 = vadd.f32 %v173_v42, %v2096_v35  ;;  %341 = vmatprep.subr.bf16.mxu1 %v297_v48  ;;  %v86_v63 = vadd.f32 %v64_v55, %v56_v54  ;;  %v194_v1 = vpack.c.bf16 %v95_v59, %v94_v58  ;;  %v57_v2 = vld [vmem:[#allocation2 + $0x38] sm:$0xff]  ;;  %v72_v4 = vld [vmem:[#allocation2 + $0xb0] sm:$0xff]  ;;  %v90_v12 = vld [vmem:[%s2469_s1] sm:$0xff]  ;;  %v189_v23 = vpack.c.bf16 %v85_v61, %v83_v46 }
  0x2b   :  { %342 = vmatpush1.bf16.msra.mxu1 %v296_v56  ;;  %v65_v3 = vld [vmem:[#allocation2 + $0x78] sm:$0xff]  ;;  %v92_v5 = vld [vmem:[%s2469_s1 + $0x10] sm:$0xff]  ;;  %v91_v13 = vld [vmem:[%s2469_s1 + $0x8] sm:$0xff]  ;;  %365 = vmatprep.mubr.bf16.mxu1 %v2018_v45 }
  0x2c   :  { %1581 = vmatpush3.bf16.msra.mxu0 %v196_v32  ;;  %v175_v62 = vadd.f32 %v174_v53, %v83_v46  ;;  %343 = vmatprep.subr.bf16.mxu1 %v295_v60  ;;  %v93_v6 = vld [vmem:[%s2469_s1 + $0x18] sm:$0xff]  ;;  %v87_v8 = vadd.f32 %v86_v63, %v72_v4  ;;  %v88_v9 = vadd.f32 %v65_v3, %v57_v2  ;;  %v114_v30 = vld [vmem:[%s2470_s2 + $0x40] sm:$0xff]  ;;  %v116_v31 = vld [vmem:[%s2470_s2 + $0x50] sm:$0xff]  ;;  %v200_v46 = vlaneseq }
  0x2d   :  { %1582 = vmatprep.subr.bf16.mxu0 %v2016_v0  ;;  %v193_v10 = vpack.c.bf16 %v93_v6, %v92_v5  ;;  %v73_v11 = vld [vmem:[#allocation2 + $0xb8] sm:$0xff]  ;;  %v192_v16 = vpack.c.bf16 %v91_v13, %v90_v12  ;;  %v294_v32 = vpack.c.bf16 %v116_v31, %v114_v30  ;;  %v111_v33 = vld [vmem:[%s2470_s2 + $0x28] sm:$0xff]  ;;  %v110_v36 = vld [vmem:[%s2470_s2 + $0x20] sm:$0xff] }
  0x2e   :  { %v176_v7 = vadd.f32 %v175_v62, %v85_v61  ;;  %v89_v14 = vadd.f32 %v88_v9, %v73_v11  ;;  %v113_v34 = vld [vmem:[%s2470_s2 + $0x38] sm:$0xff]  ;;  %v112_v37 = vld [vmem:[%s2470_s2 + $0x30] sm:$0xff]  ;;  %v107_v39 = vld [vmem:[%s2470_s2 + $0x8] sm:$0xff]  ;;  %v2190_v47 = vshrl.u32 %v200_v46, 7 }
  0x2f   :  { %344 = vmatpush1.bf16.msra.mxu1 %v294_v32  ;;  %v293_v35 = vpack.c.bf16 %v113_v34, %v111_v33  ;;  %v292_v38 = vpack.c.bf16 %v112_v37, %v110_v36  ;;  %v109_v40 = vld [vmem:[%s2470_s2 + $0x18] sm:$0xff]  ;;  %v106_v42 = vld [vmem:[%s2470_s2] sm:$0xff]  ;;  %v108_v43 = vld [vmem:[%s2470_s2 + $0x10] sm:$0xff] }
  0x30   :  { %1583 = vmatpush3.bf16.msra.mxu0 %v195_v52  ;;  %v177_v15 = vadd.f32 %v176_v7, %v87_v8  ;;  %v190_v26 = vpack.c.bf16 %v89_v14, %v87_v8  ;;  %v291_v41 = vpack.c.bf16 %v109_v40, %v107_v39  ;;  %v290_v44 = vpack.c.bf16 %v108_v43, %v106_v42  ;;  %v2198_v49 = vld [vmem:[%s2472_s4] sm:$0x77]  ;;  %v165_v31 = vld [vmem:[#allocation5 + $0x158] sm:$0xff]  ;;  %v168_v32 = vld [vmem:[#allocation5 + $0x170] sm:$0xff] }
  0x31   :  { %1584 = vmatprep.subr.bf16.mxu0 %v2016_v0  ;;  %345 = vmatprep.subr.bf16.mxu1 %v293_v35  ;;  %v2193_v48 = vsub.s32 0, %v2190_v47  ;;  %v164_v33 = vld [vmem:[#allocation5 + $0x150] sm:$0xff]  ;;  %v443_v34 = vpack.c.bf16 %v168_v32, %v165_v31  ;;  %v167_v35 = vld [vmem:[#allocation5 + $0x168] sm:$0xff]  ;;  %v158_v40 = vld [vmem:[#allocation5 + $0x120] sm:$0xff] }
  0x32   :  { %v178_v18 = vadd.f32 %v177_v15, %v89_v14  ;;  %v442_v36 = vpack.c.bf16 %v167_v35, %v164_v33  ;;  %v159_v37 = vld [vmem:[#allocation5 + $0x128] sm:$0xff]  ;;  %v166_v42 = vld [vmem:[#allocation5 + $0x160] sm:$0xff]  ;;  %v133_v32 = vld [vmem:[#allocation5 + $0x58] sm:$0xff] }
  0x33   :  { %346 = vmatpush1.bf16.msra.mxu1 %v292_v38  ;;  %v203_v50 = vrot.slane %v2198_v49, %v2193_v48  ;;  %v162_v38 = vld [vmem:[#allocation5 + $0x140] sm:$0xff]  ;;  %v123_v35 = vld [vmem:[#allocation5 + $0x8] sm:$0xff] }
  0x34   :  { %1585 = vmatpush3.bf16.msra.mxu0 %v194_v1  ;;  %v179_v19 = vrot.slane %v178_v18, 4  ;;  %347 = vmatprep.subr.bf16.mxu1 %v291_v41  ;;  %v440_v39 = vpack.c.bf16 %v162_v38, %v159_v37  ;;  %v161_v41 = vld [vmem:[#allocation5 + $0x138] sm:$0xff]  ;;  %v130_v31 = vld [vmem:[#allocation5 + $0x40] sm:$0xff] }
  0x35   :  { %1586 = vmatprep.subr.bf16.mxu0 %v2016_v0  ;;  %v439_v43 = vpack.c.bf16 %v161_v41, %v158_v40  ;;  %v122_v38 = vld [vmem:[#allocation5] sm:$0xff]  ;;  %v124_v40 = vld [vmem:[#allocation5 + $0x10] sm:$0xff] }
  0x36   :  { %v180_v21 = vadd.f32 %v179_v19, %v178_v18 }
  0x37   :  { %348 = vmatpush1.bf16.msra.mxu1 %v290_v44  ;;  %v169_v44 = vld [vmem:[#allocation5 + $0x178] sm:$0xff] }
  0x38   :  { %1587 = vmatpush3.bf16.msra.mxu0 %v193_v10  ;;  %v181_v22 = vrot.slane %v180_v21, 2  ;;  %473 = vmatprep.subr.bf16.mxu1 %v443_v34  ;;  %v444_v46 = vpack.c.bf16 %v169_v44, %v166_v42  ;;  %v426_v34 = vpack.c.bf16 %v133_v32, %v130_v31  ;;  %v127_v42 = vld [vmem:[#allocation5 + $0x28] sm:$0xff] }
  0x39   :  { %1588 = vmatprep.subr.bf16.mxu0 %v2016_v0 }
  0x3a   :  { %v182_v24 = vadd.f32 %v181_v22, %v180_v21 }
  0x3c   :  { %1589 = vmatpush3.bf16.msra.mxu0 %v192_v16  ;;  %v183_v25 = vrot.slane %v182_v24, 1 }
  0x3d   :  { %1610 = vmatprep.subr.bf16.mxu0 %v444_v46 }
  0x3e   :  { %v184_v27 = vadd.f32 %v183_v25, %v182_v24 }
  0x3f   :  { %1591 = vmatmul.mubr.bf16.vlgmr.msra.gmra.mxu0 %v187_v17 }
  0x40   :  { %1594 = vmatprep.mubr.msk.bf16.mxu0 %vm2017_vm0, %v2016_v0  ;;  %v186_v28 = vmul.f32 0.015625, %v184_v27  ;;  %1611 = vmatpush3.bf16.msra.mxu0 %v444_v46 }
  0x42   :  { %v191_v29 = vpack.c.bf16 %v186_v28, %v186_v28 }
  0x47   :  { %1595 = vmatmul.mubr.bf16.gmra.mxu0 %v188_v20 }
  0x48   :  { %1598 = vmatprep.mubr.msk.bf16.mxu0 %vm2017_vm0, %v2016_v0 }
  0x4f   :  { %1599 = vmatmul.mubr.bf16.gmra.mxu0 %v189_v23 }
  0x50   :  { %1602 = vmatprep.mubr.msk.bf16.mxu0 %vm2017_vm0, %v2016_v0 }
  0x57   :  { %1603 = vmatmul.mubr.bf16.gmra.mxu0 %v190_v26 }
  0x58   :  { %1606 = vmatprep.mubr.msk.bf16.mxu0 %vm2017_vm0, %v2016_v0 }
  0x5f   :  { %1607 = vmatmul.mubr.bf16.gmra.mxu0 %v191_v29 }
  0xff   :  { %v238_v51 = vpop.f32.mrf.mxu0 }
 0x100   :  { %v239_v53 = vadd.f32 %v238_v51, %v203_v50  ;;  %v156_v51 = vld [vmem:[#allocation5 + $0x110] sm:$0xff] }
 0x101   :  { %v1592_v52 = vpop.f32.mrf.mxu0 }
 0x102   :  { %v276_v57 = vmax.f32 %v239_v53, 0.0  ;;  %v152_v52 = vld [vmem:[#allocation5 + $0xf0] sm:$0xff] }
 0x103   :  { %v241_v54 = vpop.f32.mrf.mxu0 }
 0x104   :  { %v242_v55 = vadd.f32 %v241_v54, %v203_v50  ;;  %v155_v54 = vld [vmem:[#allocation5 + $0x108] sm:$0xff] }
 0x105   :  { %v1593_v56 = vpop.f32.mrf.mxu0 }
 0x106   :  { %v277_v58 = vmax.f32 %v242_v55, 0.0  ;;  %v160_v55 = vld [vmem:[#allocation5 + $0x130] sm:$0xff]  ;;  %v163_v56 = vld [vmem:[#allocation5 + $0x148] sm:$0xff] }
 0x107   :  { %v246_v59 = vpop.f32.mrf.mxu0 }
 0x108   :  { %v285_v60 = vpack.c.bf16 %v277_v58, %v276_v57  ;;  %v247_v62 = vadd.f32 %v246_v59, %v203_v50  ;;  %v436_v57 = vpack.c.bf16 %v155_v54, %v152_v52  ;;  %v441_v58 = vpack.c.bf16 %v163_v56, %v160_v55  ;;  %v147_v59 = vld [vmem:[#allocation5 + $0xc8] sm:$0xff] }
 0x109   :  { %v1596_v61 = vpop.f32.mrf.mxu0 }
 0x10a   :  { %1480 = vmatmul.mubr.msk.bf16.vlgmr.msra.gmra.mxu1 %vm317_vm1, %v285_v60  ;;  %v278_v3 = vmax.f32 %v247_v62, 0.0  ;;  %1612 = vmatprep.subr.bf16.mxu0 %v441_v58  ;;  %v150_v60 = vld [vmem:[#allocation5 + $0xe0] sm:$0xff] }
 0x10b   :  { %v249_v63 = vpop.f32.mrf.mxu0  ;;  %373 = vmatprep.mubr.bf16.mxu1 %v2018_v45  ;;  %474 = vmatpush1.bf16.msra.mxu1 %v442_v36  ;;  %v154_v61 = vld [vmem:[#allocation5 + $0x100] sm:$0xff]  ;;  %v434_v62 = vpack.c.bf16 %v150_v60, %v147_v59  ;;  %v305_v60 = vsub.s32 5, %v2190_v47 }
 0x10c   :  { %v250_v1 = vadd.f32 %v249_v63, %v203_v50  ;;  %475 = vmatprep.subr.bf16.mxu1 %v440_v39  ;;  %1613 = vmatpush3.bf16.msra.mxu0 %v441_v58  ;;  %v146_v63 = vld [vmem:[#allocation5 + $0xc0] sm:$0xff]  ;;  %v125_v39 = vld [vmem:[#allocation5 + $0x18] sm:$0xff] }
 0x10d   :  { %v1597_v2 = vpop.f32.mrf.mxu0  ;;  %v126_v36 = vld [vmem:[#allocation5 + $0x20] sm:$0xff]  ;;  %v421_v41 = vpack.c.bf16 %v125_v39, %v122_v38  ;;  %v1495_v39 = vld [vmem:[%s2469_s1 + $0xd0] sm:$0xff] }
 0x10e   :  { %v279_v4 = vmax.f32 %v250_v1, 0.0  ;;  %v149_v1 = vld [vmem:[#allocation5 + $0xd8] sm:$0xff]  ;;  %v422_v37 = vpack.c.bf16 %v126_v36, %v123_v35  ;;  %v1497_v36 = vld [vmem:[%s2469_s1 + $0xe0] sm:$0xff] }
 0x10f   :  { %v254_v5 = vpop.f32.mrf.mxu0  ;;  %476 = vmatpush1.bf16.msra.mxu1 %v439_v43  ;;  %v157_v2 = vld [vmem:[#allocation5 + $0x118] sm:$0xff]  ;;  %v423_v43 = vpack.c.bf16 %v127_v42, %v124_v40  ;;  %v1493_v42 = vld [vmem:[%s2469_s1 + $0xc0] sm:$0xff] }
 0x110   :  { %v286_v6 = vpack.c.bf16 %v279_v4, %v278_v3  ;;  %v255_v8 = vadd.f32 %v254_v5, %v203_v50  ;;  %v433_v3 = vpack.c.bf16 %v149_v1, %v146_v63  ;;  %v438_v4 = vpack.c.bf16 %v157_v2, %v154_v61  ;;  %v148_v5 = vld [vmem:[#allocation5 + $0xd0] sm:$0xff]  ;;  %v1496_v40 = vld [vmem:[%s2469_s1 + $0xd8] sm:$0xff] }
 0x111   :  { %v1600_v7 = vpop.f32.mrf.mxu0  ;;  %v2215_v61 = vsub.s32 1, %v2190_v47  ;;  %v306_v1 = vrot.slane %v2198_v49, %v305_v60 }
 0x112   :  { %1481 = vmatmul.mubr.msk.bf16.gmra.mxu1 %vm317_vm1, %v286_v6  ;;  %v280_v12 = vmax.f32 %v255_v8, 0.0  ;;  %1614 = vmatprep.subr.bf16.mxu0 %v438_v4  ;;  %v151_v6 = vld [vmem:[#allocation5 + $0xe8] sm:$0xff]  ;;  %v141_v7 = vld [vmem:[#allocation5 + $0x98] sm:$0xff]  ;;  %v144_v8 = vld [vmem:[#allocation5 + $0xb0] sm:$0xff] }
 0x113   :  { %v257_v9 = vpop.f32.mrf.mxu0  ;;  %381 = vmatprep.mubr.bf16.mxu1 %v2018_v45  ;;  %1615 = vmatpush3.bf16.msra.mxu0 %v438_v4  ;;  %v302_v2 = vrot.slane %v2198_v49, %v2215_v61 }
 0x114   :  { %v258_v10 = vadd.f32 %v257_v9, %v203_v50  ;;  %v140_v9 = vld [vmem:[#allocation5 + $0x90] sm:$0xff] }
 0x115   :  { %v1601_v11 = vpop.f32.mrf.mxu0 }
 0x116   :  { %v281_v13 = vmax.f32 %v258_v10, 0.0  ;;  %v435_v10 = vpack.c.bf16 %v151_v6, %v148_v5  ;;  %v431_v11 = vpack.c.bf16 %v144_v8, %v141_v7  ;;  %v316_v5 = vrot.slane %v306_v1, %v2215_v61  ;;  %v1516_v1 = vld [vmem:[%s2470_s2 + $0xf8] sm:$0xff] }
 0x117   :  { %v262_v14 = vpop.f32.mrf.mxu0  ;;  %v312_v6 = vrot.slane %v302_v2, %v2215_v61  ;;  %v1513_v2 = vld [vmem:[%s2470_s2 + $0xe0] sm:$0xff] }
 0x118   :  { %v287_v15 = vpack.c.bf16 %v281_v13, %v280_v12  ;;  %v263_v17 = vadd.f32 %v262_v14, %v203_v50  ;;  %v143_v12 = vld [vmem:[#allocation5 + $0xa8] sm:$0xff]  ;;  %1616 = vmatprep.subr.bf16.mxu0 %v435_v10  ;;  %v142_v14 = vld [vmem:[#allocation5 + $0xa0] sm:$0xff] }
 0x119   :  { %v1604_v16 = vpop.f32.mrf.mxu0  ;;  %v430_v13 = vpack.c.bf16 %v143_v12, %v140_v9  ;;  %1617 = vmatpush3.bf16.msra.mxu0 %v435_v10 }
 0x11a   :  { %1482 = vmatmul.mubr.msk.bf16.gmra.mxu1 %vm317_vm1, %v287_v15  ;;  %v282_v21 = vmax.f32 %v263_v17, 0.0  ;;  %v145_v15 = vld [vmem:[#allocation5 + $0xb8] sm:$0xff]  ;;  %v135_v16 = vld [vmem:[#allocation5 + $0x68] sm:$0xff]  ;;  %v138_v17 = vld [vmem:[#allocation5 + $0x80] sm:$0xff] }
 0x11b   :  { %v265_v18 = vpop.f32.mrf.mxu0  ;;  %389 = vmatprep.mubr.bf16.mxu1 %v2018_v45 }
 0x11c   :  { %v266_v19 = vadd.f32 %v265_v18, %v203_v50  ;;  %v432_v18 = vpack.c.bf16 %v145_v15, %v142_v14 }
 0x11d   :  { %v1605_v20 = vpop.f32.mrf.mxu0 }
 0x11e   :  { %v283_v22 = vmax.f32 %v266_v19, 0.0  ;;  %v428_v19 = vpack.c.bf16 %v138_v17, %v135_v16  ;;  %1618 = vmatprep.subr.bf16.mxu0 %v432_v18  ;;  %v134_v20 = vld [vmem:[#allocation5 + $0x60] sm:$0xff] }
 0x11f   :  { %v270_v23 = vpop.f32.mrf.mxu0  ;;  %1619 = vmatpush3.bf16.msra.mxu0 %v432_v18 }
 0x120   :  { %v288_v24 = vpack.c.bf16 %v283_v22, %v282_v21  ;;  %v271_v25 = vadd.f32 %v270_v23, %v203_v50  ;;  %v153_v50 = vld [vmem:[#allocation5 + $0xf8] sm:$0xff]  ;;  %v136_v22 = vld [vmem:[#allocation5 + $0x70] sm:$0xff] }
 0x121   :  { %v1608_v26 = vpop.f32.mrf.mxu0  ;;  %v437_v53 = vpack.c.bf16 %v156_v51, %v153_v50  ;;  %v137_v21 = vld [vmem:[#allocation5 + $0x78] sm:$0xff] }
 0x122   :  { %v284_v27 = vmax.f32 %v271_v25, 0.0  ;;  %1483 = vmatmul.mubr.msk.bf16.gmra.mxu1 %vm317_vm1, %v288_v24  ;;  %v427_v23 = vpack.c.bf16 %v137_v21, %v134_v20  ;;  %v139_v24 = vld [vmem:[#allocation5 + $0x88] sm:$0xff]  ;;  %v129_v26 = vld [vmem:[#allocation5 + $0x38] sm:$0xff] }
 0x123   :  { %v273_v28 = vpop.f32.mrf.mxu0  ;;  %397 = vmatprep.mubr.bf16.mxu1 %v2018_v45  ;;  %477 = vmatprep.subr.bf16.mxu1 %v437_v53  ;;  %v429_v25 = vpack.c.bf16 %v139_v24, %v136_v22 }
 0x124   :  { %v289_v30 = vpack.c.bf16 %v284_v27, %v284_v27  ;;  %478 = vmatpush1.bf16.msra.mxu1 %v436_v57  ;;  %v132_v27 = vld [vmem:[#allocation5 + $0x50] sm:$0xff] }
 0x125   :  { %v1609_v29 = vpop.f32.mrf.mxu0  ;;  %479 = vmatprep.subr.bf16.mxu1 %v434_v62  ;;  %v128_v28 = vld [vmem:[#allocation5 + $0x30] sm:$0xff]  ;;  %1620 = vmatprep.subr.bf16.mxu0 %v429_v25 }
 0x126   :  { %v425_v29 = vpack.c.bf16 %v132_v27, %v129_v26  ;;  %1621 = vmatpush3.bf16.msra.mxu0 %v429_v25 }
 0x127   :  { %1622 = vmatprep.subr.bf16.mxu0 %v426_v34 }
 0x128   :  { %480 = vmatpush1.bf16.msra.mxu1 %v433_v3 }
 0x129   :  { %481 = vmatprep.subr.bf16.mxu1 %v431_v11 }
 0x12a   :  { %1484 = vmatmul.mubr.msk.bf16.gmra.mxu1 %vm317_vm1, %v289_v30  ;;  %v131_v30 = vld [vmem:[#allocation5 + $0x48] sm:$0xff]  ;;  %1623 = vmatpush3.bf16.msra.mxu0 %v426_v34  ;;  %v1500_v34 = vld [vmem:[%s2469_s1 + $0xf8] sm:$0xff] }
 0x12b   :  { %505 = vmatprep.mubr.bf16.mxu1 %v2018_v45  ;;  %v424_v33 = vpack.c.bf16 %v131_v30, %v128_v28  ;;  %1624 = vmatprep.subr.bf16.mxu0 %v423_v43 }
 0x12c   :  { %482 = vmatpush1.bf16.msra.mxu1 %v430_v13 }
 0x12d   :  { %483 = vmatprep.subr.bf16.mxu1 %v428_v19 }
 0x12e   :  { %1625 = vmatpush3.bf16.msra.mxu0 %v423_v43  ;;  %v1494_v43 = vld [vmem:[%s2469_s1 + $0xc8] sm:$0xff] }
 0x130   :  { %484 = vmatpush1.bf16.msra.mxu1 %v427_v23 }
 0x131   :  { %485 = vmatprep.subr.bf16.mxu1 %v425_v29 }
 0x134   :  { %486 = vmatpush1.bf16.msra.mxu1 %v424_v33  ;;  %v1499_v33 = vld [vmem:[%s2469_s1 + $0xf0] sm:$0xff] }
 0x135   :  { %487 = vmatprep.subr.bf16.mxu1 %v422_v37  ;;  %v883_v35 = vpack.c.bf16 %v1500_v34, %v1499_v33  ;;  %v1498_v37 = vld [vmem:[%s2469_s1 + $0xe8] sm:$0xff] }
 0x136   :  { %v882_v38 = vpack.c.bf16 %v1498_v37, %v1497_v36 }
 0x138   :  { %488 = vmatpush1.bf16.msra.mxu1 %v421_v41  ;;  %v881_v41 = vpack.c.bf16 %v1496_v40, %v1495_v39 }
 0x139   :  { %1634 = vmatprep.subr.bf16.mxu1 %v2016_v0 }
 0x1ca   :  { %v367_v44 = vpop.f32.mrf.mxu1 }
 0x1cb   :  { %v368_v10 = vadd.f32 %v367_v44, %v312_v6  ;;  %v880_v44 = vpack.c.bf16 %v1494_v43, %v1493_v42 }
 0x1cc   :  { %v369_v46 = vpop.f32.mrf.mxu1 }
 0x1cd   :  { %v1491_v46 = vld [vmem:[%s2469_s1 + $0xb0] sm:$0xff] }
 0x1ce   :  { %v370_v50 = vpop.f32.mrf.mxu1 }
 0x1cf   :  { %v371_v12 = vadd.f32 %v370_v50, %v312_v6  ;;  %v1492_v50 = vld [vmem:[%s2469_s1 + $0xb8] sm:$0xff] }
 0x1d0   :  { %v372_v51 = vpop.f32.mrf.mxu1 }
 0x1d1   :  { %v879_v51 = vpack.c.bf16 %v1492_v50, %v1491_v46 }
 0x1d2   :  { %v375_v52 = vpop.f32.mrf.mxu1 }
 0x1d3   :  { %v376_v13 = vadd.f32 %v375_v52, %v312_v6  ;;  %v1489_v52 = vld [vmem:[%s2469_s1 + $0xa0] sm:$0xff] }
 0x1d4   :  { %v377_v53 = vpop.f32.mrf.mxu1 }
 0x1d5   :  { %v1490_v53 = vld [vmem:[%s2469_s1 + $0xa8] sm:$0xff] }
 0x1d6   :  { %v378_v54 = vpop.f32.mrf.mxu1 }
 0x1d7   :  { %v379_v14 = vadd.f32 %v378_v54, %v312_v6  ;;  %v878_v54 = vpack.c.bf16 %v1490_v53, %v1489_v52 }
 0x1d8   :  { %v380_v55 = vpop.f32.mrf.mxu1 }
 0x1d9   :  { %v1487_v55 = vld [vmem:[%s2469_s1 + $0x90] sm:$0xff] }
 0x1da   :  { %v383_v56 = vpop.f32.mrf.mxu1 }
 0x1db   :  { %v384_v16 = vadd.f32 %v383_v56, %v312_v6  ;;  %v1488_v56 = vld [vmem:[%s2469_s1 + $0x98] sm:$0xff] }
 0x1dc   :  { %v385_v57 = vpop.f32.mrf.mxu1 }
 0x1dd   :  { %v877_v57 = vpack.c.bf16 %v1488_v56, %v1487_v55 }
 0x1de   :  { %v386_v58 = vpop.f32.mrf.mxu1 }
 0x1df   :  { %v387_v17 = vadd.f32 %v386_v58, %v312_v6  ;;  %v1485_v58 = vld [vmem:[%s2469_s1 + $0x80] sm:$0xff] }
 0x1e0   :  { %v388_v59 = vpop.f32.mrf.mxu1 }
 0x1e1   :  { %v1486_v59 = vld [vmem:[%s2469_s1 + $0x88] sm:$0xff] }
 0x1e2   :  { %v391_v62 = vpop.f32.mrf.mxu1 }
 0x1e3   :  { %v392_v28 = vadd.f32 %v391_v62, %v312_v6  ;;  %v876_v62 = vpack.c.bf16 %v1486_v59, %v1485_v58 }
 0x1e4   :  { %v393_v63 = vpop.f32.mrf.mxu1 }
 0x1e5   :  { %v1514_v63 = vld [vmem:[%s2470_s2 + $0xe8] sm:$0xff] }
 0x1e6   :  { %v394_v3 = vpop.f32.mrf.mxu1 }
 0x1e7   :  { %v395_v29 = vadd.f32 %v394_v3, %v312_v6  ;;  %v981_v3 = vpack.c.bf16 %v1516_v1, %v1514_v63  ;;  %v1512_v6 = vld [vmem:[%s2470_s2 + $0xd8] sm:$0xff] }
 0x1e8   :  { %v396_v4 = vpop.f32.mrf.mxu1 }
 0x1e9   :  { %v1515_v4 = vld [vmem:[%s2470_s2 + $0xf0] sm:$0xff]  ;;  %1024 = vmatprep.subr.bf16.mxu0 %v981_v3 }
 0x1ea   :  { %v399_v7 = vpop.f32.mrf.mxu1 }
 0x1eb   :  { %v980_v7 = vpack.c.bf16 %v1515_v4, %v1513_v2 }
 0x1ec   :  { %v400_v8 = vpop.f32.mrf.mxu1 }
 0x1ed   :  { %v401_v9 = vadd.f32 %v400_v8, %v316_v5  ;;  %v1510_v5 = vld [vmem:[%s2470_s2 + $0xc8] sm:$0xff] }
 0x1ee   :  { %v402_v11 = vpop.f32.mrf.mxu1  ;;  %v979_v8 = vpack.c.bf16 %v1512_v6, %v1510_v5 }
 0x1ef   :  { %v408_v15 = vrot.slane %v401_v9, %v2193_v48  ;;  %v2305_v9 = vsub.s32 2, %v2190_v47  ;;  %v452_v11 = vsub.s32 6, %v2190_v47 }
 0x1f0   :  { %v403_v18 = vpop.f32.mrf.mxu1 }
 0x1f1   :  { %v409_v19 = vadd.f32 %v408_v15, %v368_v10  ;;  %v410_v20 = vadd.f32 %v408_v15, %v371_v12  ;;  %v411_v21 = vadd.f32 %v408_v15, %v376_v13  ;;  %v412_v22 = vadd.f32 %v408_v15, %v379_v14  ;;  %v171_v10 = vld [vmem:[%s2472_s4 + $0x8] sm:$0x7] }
 0x1f2   :  { %v413_v23 = vadd.f32 %v408_v15, %v384_v16  ;;  %v414_v24 = vadd.f32 %v408_v15, %v387_v17  ;;  %v415_v30 = vadd.f32 %v408_v15, %v392_v28  ;;  %v416_v31 = vadd.f32 %v408_v15, %v395_v29 }
 0x1f3   :  { %v417_v25 = vpack.c.bf16 %v410_v20, %v409_v19  ;;  %v418_v26 = vpack.c.bf16 %v412_v22, %v411_v21  ;;  %v449_v12 = vrot.slane %v2198_v49, %v2305_v9  ;;  %v457_v13 = vrot.slane %v171_v10, %v2305_v9 }
 0x1f4   :  { %v419_v27 = vpack.c.bf16 %v414_v24, %v413_v23  ;;  %v420_v32 = vpack.c.bf16 %v416_v31, %v415_v30  ;;  %v453_v14 = vrot.slane %v2198_v49, %v452_v11 }
 0x1f5   :  { %506 = vmatmul.mubr.bf16.vlgmr.msra.gmra.mxu1 %v417_v25  ;;  %1626 = vmatprep.mubr.bf16.mxu0 %v417_v25  ;;  %v2318_v15 = vrot.slane %v449_v12, %v2305_v9  ;;  %v2321_v16 = vrot.slane %v457_v13, %v2305_v9 }
 0x1f6   :  { %1627 = vmatmul.mubr.bf16.vlgmr.msra.gmra.mxu0 %v418_v26  ;;  %515 = vmatprep.mubr.bf16.mxu1 %v2018_v45  ;;  %v2324_v17 = vrot.slane %v453_v14, %v2305_v9 }
 0x1f7   :  { %1630 = vmatprep.mubr.bf16.mxu0 %v419_v27  ;;  %1635 = vmatpush3.bf16.msra.mxu1 %v883_v35 }
 0x1f8   :  { %1636 = vmatprep.subr.bf16.mxu1 %v2016_v0  ;;  %1025 = vmatpush1.bf16.msra.mxu0 %v980_v7 }
 0x1f9   :  { %1026 = vmatprep.subr.bf16.mxu0 %v979_v8 }
 0x1fb   :  { %1637 = vmatpush3.bf16.msra.mxu1 %v882_v38 }
 0x1fc   :  { %1638 = vmatprep.subr.bf16.mxu1 %v2016_v0 }
 0x1fd   :  { %516 = vmatmul.mubr.bf16.gmra.mxu1 %v418_v26 }
 0x1fe   :  { %1631 = vmatmul.mubr.bf16.gmra.mxu0 %v420_v32  ;;  %525 = vmatprep.mubr.bf16.mxu1 %v2018_v45 }
 0x1ff   :  { %1048 = vmatprep.mubr.bf16.mxu0 %v2018_v45  ;;  %1639 = vmatpush3.bf16.msra.mxu1 %v881_v41 }
 0x200   :  { %1640 = vmatprep.subr.bf16.mxu1 %v2016_v0 }
 0x203   :  { %1641 = vmatpush3.bf16.msra.mxu1 %v880_v44 }
 0x204   :  { %1642 = vmatprep.subr.bf16.mxu1 %v2016_v0 }
 0x205   :  { %526 = vmatmul.mubr.bf16.gmra.mxu1 %v419_v27 }
 0x206   :  { %535 = vmatprep.mubr.bf16.mxu1 %v2018_v45 }
 0x207   :  { %1643 = vmatpush3.bf16.msra.mxu1 %v879_v51 }
 0x208   :  { %1644 = vmatprep.subr.bf16.mxu1 %v2016_v0 }
 0x20b   :  { %1645 = vmatpush3.bf16.msra.mxu1 %v878_v54 }
 0x20c   :  { %1646 = vmatprep.subr.bf16.mxu1 %v2016_v0 }
 0x20d   :  { %536 = vmatmul.mubr.bf16.gmra.mxu1 %v420_v32 }
 0x20e   :  { %1650 = vmatprep.mubr.msk.bf16.mxu1 %vm2017_vm0, %v2016_v0 }
 0x20f   :  { %1647 = vmatpush3.bf16.msra.mxu1 %v877_v57 }
 0x210   :  { %1648 = vmatprep.subr.bf16.mxu1 %v2016_v0 }
 0x213   :  { %1649 = vmatpush3.bf16.msra.mxu1 %v876_v62 }
 0x2b5   :  { %v507_v18 = vpop.f32.mrf.mxu1 }
 0x2b6   :  { %v508_v19 = vadd.f32 %v507_v18, %v2318_v15  ;;  %v1628_v20 = vpop.f32.mrf.mxu0 }
 0x2b7   :  { %v589_v21 = vadd.f32 %v1628_v20, %v2321_v16  ;;  %v509_v22 = vpop.f32.mrf.mxu1 }
 0x2b8   :  { %v611_v23 = vsub.f32 0.0, %v508_v19  ;;  %v510_v24 = vadd.f32 %v509_v22, %v2324_v17  ;;  %v580_v49 = vpop.f32.mrf.mxu0 }
 0x2b9   :  { %v717_v25 = vsub.f32 0.0, %v589_v21  ;;  %v581_v26 = vadd.f32 %v580_v49, %v2321_v16  ;;  %v511_v27 = vpop.f32.mrf.mxu1 }
 0x2ba   :  { %v619_v28 = vmul.f32 1.442695, %v611_v23  ;;  %v659_v29 = vsub.f32 0.0, %v510_v24  ;;  %v512_v30 = vadd.f32 %v511_v27, %v2318_v15  ;;  %v1629_v31 = vpop.f32.mrf.mxu0 }
 0x2bb   :  { %v715_v32 = vsub.f32 0.0, %v581_v26  ;;  %v592_v33 = vadd.f32 %v1629_v31, %v2321_v16  ;;  %v513_v34 = vpop.f32.mrf.mxu1  ;;  %v727_v39 = vmul.f32 1.442695, %v717_v25 }
 0x2bc   :  { %1704 = vpow2.f32 %v619_v28  ;;  %v667_v35 = vmul.f32 1.442695, %v659_v29  ;;  %v612_v36 = vsub.f32 0.0, %v512_v30  ;;  %v514_v37 = vadd.f32 %v513_v34, %v2324_v17  ;;  %v583_v38 = vpop.f32.mrf.mxu0 }
 0x2bd   :  { %v723_v40 = vmul.f32 1.442695, %v715_v32  ;;  %v718_v41 = vsub.f32 0.0, %v592_v33  ;;  %v584_v42 = vadd.f32 %v583_v38, %v2321_v16  ;;  %v517_v43 = vpop.f32.mrf.mxu1 }
 0x2be   :  { %1706 = vpow2.f32 %v667_v35  ;;  %v621_v44 = vmul.f32 1.442695, %v612_v36  ;;  %v660_v46 = vsub.f32 0.0, %v514_v37  ;;  %v518_v50 = vadd.f32 %v517_v43, %v2318_v15  ;;  %v1632_v51 = vpop.f32.mrf.mxu0 }
 0x2bf   :  { %1708 = vpow2.f32 %v723_v40  ;;  %v716_v52 = vsub.f32 0.0, %v584_v42  ;;  %v605_v53 = vadd.f32 %v1632_v51, %v2321_v16  ;;  %v519_v54 = vpop.f32.mrf.mxu1  ;;  %v729_v59 = vmul.f32 1.442695, %v718_v41 }
 0x2c0   :  { %1710 = vpow2.f32 %v621_v44  ;;  %v669_v55 = vmul.f32 1.442695, %v660_v46  ;;  %v613_v56 = vsub.f32 0.0, %v518_v50  ;;  %v520_v57 = vadd.f32 %v519_v54, %v2324_v17  ;;  %v596_v58 = vpop.f32.mrf.mxu0 }
 0x2c1   :  { %1712 = vpow2.f32 %v727_v39  ;;  %v725_v62 = vmul.f32 1.442695, %v716_v52  ;;  %v597_v63 = vadd.f32 %v596_v58, %v2321_v16  ;;  %v521_v1 = vpop.f32.mrf.mxu1  ;;  %v721_v6 = vsub.f32 0.0, %v605_v53 }
 0x2c2   :  { %1714 = vpow2.f32 %v669_v55  ;;  %v623_v2 = vmul.f32 1.442695, %v613_v56  ;;  %v661_v3 = vsub.f32 0.0, %v520_v57  ;;  %v522_v4 = vadd.f32 %v521_v1, %v2318_v15  ;;  %v1633_v5 = vpop.f32.mrf.mxu0 }
 0x2c3   :  { %1716 = vpow2.f32 %v725_v62  ;;  %v719_v7 = vsub.f32 0.0, %v597_v63  ;;  %v523_v8 = vpop.f32.mrf.mxu1  ;;  %v608_v14 = vadd.f32 %v1633_v5, %v2321_v16  ;;  %v735_v22 = vmul.f32 1.442695, %v721_v6 }
 0x2c4   :  { %1718 = vpow2.f32 %v623_v2  ;;  %v671_v10 = vmul.f32 1.442695, %v661_v3  ;;  %v614_v12 = vsub.f32 0.0, %v522_v4  ;;  %v524_v13 = vadd.f32 %v523_v8, %v2324_v17  ;;  %v599_v18 = vpop.f32.mrf.mxu0 }
 0x2c5   :  { %1720 = vpow2.f32 %v729_v59  ;;  %v527_v19 = vpop.f32.mrf.mxu1  ;;  %v731_v24 = vmul.f32 1.442695, %v719_v7  ;;  %v600_v25 = vadd.f32 %v599_v18, %v2321_v16  ;;  %v722_v27 = vsub.f32 0.0, %v608_v14 }
 0x2c6   :  { %1722 = vpow2.f32 %v671_v10  ;;  %v625_v20 = vmul.f32 1.442695, %v614_v12  ;;  %v662_v21 = vsub.f32 0.0, %v524_v13  ;;  %v528_v46 = vadd.f32 %v527_v19, %v2318_v15 }
 0x2c7   :  { %v529_v23 = vpop.f32.mrf.mxu1  ;;  %v720_v34 = vsub.f32 0.0, %v600_v25  ;;  %v737_v37 = vmul.f32 1.442695, %v722_v27 }
 0x2c8   :  { %1724 = vpow2.f32 %v625_v20  ;;  %v673_v49 = vmul.f32 1.442695, %v662_v21  ;;  %v530_v52 = vadd.f32 %v529_v23, %v2324_v17  ;;  %v615_v63 = vsub.f32 0.0, %v528_v46 }
 0x2c9   :  { %v1705_v26 = vpop.eup %1704  ;;  %v531_v28 = vpop.f32.mrf.mxu1  ;;  %v733_v44 = vmul.f32 1.442695, %v720_v34 }
 0x2ca   :  { %v635_v29 = vadd.f32 1.0, %v1705_v26  ;;  %1726 = vpow2.f32 %v673_v49  ;;  %v532_v56 = vadd.f32 %v531_v28, %v2318_v15  ;;  %v663_v5 = vsub.f32 0.0, %v530_v52  ;;  %v1901_v52 = vld [vmem:[#allocation2 + $0x88] sm:$0xff] }
 0x2cb   :  { %v1707_v30 = vpop.eup %1706  ;;  %1728 = vpow2.f32 %v735_v22  ;;  %v533_v31 = vpop.f32.mrf.mxu1  ;;  %v627_v20 = vmul.f32 1.442695, %v615_v63 }
 0x2cc   :  { %v1709_v32 = vpop.eup %1708  ;;  %v683_v33 = vadd.f32 1.0, %v1707_v30  ;;  %1730 = vpow2.f32 %v731_v24  ;;  %v534_v59 = vadd.f32 %v533_v31, %v2324_v17  ;;  %v616_v8 = vsub.f32 0.0, %v532_v56 }
 0x2cd   :  { %v1711_v35 = vpop.eup %1710  ;;  %1732 = vrcp.f32 %v635_v29  ;;  %v739_v36 = vadd.f32 1.0, %v1709_v32  ;;  %v537_v38 = vpop.f32.mrf.mxu1  ;;  %v675_v23 = vmul.f32 1.442695, %v663_v5 }
 0x2ce   :  { %v1713_v39 = vpop.eup %1712  ;;  %1734 = vrcp.f32 %v683_v33  ;;  %v636_v16 = vadd.f32 1.0, %v1711_v35  ;;  %v538_v1 = vadd.f32 %v537_v38, %v2318_v15  ;;  %v664_v13 = vsub.f32 0.0, %v534_v59 }
 0x2cf   :  { %v1715_v40 = vpop.eup %1714  ;;  %1736 = vrcp.f32 %v739_v36  ;;  %v539_v41 = vpop.f32.mrf.mxu1  ;;  %v741_v58 = vadd.f32 1.0, %v1713_v39  ;;  %v629_v25 = vmul.f32 1.442695, %v616_v8  ;;  %v1897_v36 = vld [vmem:[#allocation2] sm:$0xff] }
 0x2d0   :  { %v1717_v42 = vpop.eup %1716  ;;  %1738 = vrcp.f32 %v636_v16  ;;  %v684_v43 = vadd.f32 1.0, %v1715_v40  ;;  %v540_v6 = vadd.f32 %v539_v41, %v2324_v17  ;;  %v617_v21 = vsub.f32 0.0, %v538_v1  ;;  %v1898_v16 = vld [vmem:[#allocation2 + $0x80] sm:$0xff]  ;;  %v1902_v1 = vld [vmem:[#allocation2 + $0x50] sm:$0xff] }
 0x2d1   :  { %v1719_v50 = vpop.eup %1718  ;;  %v740_v51 = vadd.f32 1.0, %v1717_v42  ;;  %1740 = vpow2.f32 %v737_v37  ;;  %v541_v53 = vpop.f32.mrf.mxu1  ;;  %v1899_v42 = vld [vmem:[#allocation2 + $0x8] sm:$0xff] }
 0x2d2   :  { %v1721_v54 = vpop.eup %1720  ;;  %1742 = vrcp.f32 %v684_v43  ;;  %v637_v55 = vadd.f32 1.0, %v1719_v50  ;;  %v542_v10 = vadd.f32 %v541_v53, %v2318_v15  ;;  %v665_v24 = vsub.f32 0.0, %v540_v6 }
 0x2d3   :  { %v1723_v57 = vpop.eup %1722  ;;  %1744 = vrcp.f32 %v740_v51  ;;  %v543_v2 = vpop.f32.mrf.mxu1  ;;  %v742_v4 = vadd.f32 1.0, %v1721_v54  ;;  %v677_v15 = vmul.f32 1.442695, %v664_v13  ;;  %v631_v30 = vmul.f32 1.442695, %v617_v21  ;;  %v1904_v13 = vld [vmem:[#allocation2 + $0x18] sm:$0xff] }
 0x2d4   :  { %v685_v62 = vadd.f32 1.0, %v1723_v57  ;;  %1746 = vpow2.f32 %v733_v44  ;;  %v544_v14 = vadd.f32 %v543_v2, %v2324_v17  ;;  %v618_v26 = vsub.f32 0.0, %v542_v10  ;;  %v1896_v17 = vld [vmem:[#allocation2 + $0x40] sm:$0xff]  ;;  %v1900_v44 = vld [vmem:[#allocation2 + $0x48] sm:$0xff] }
 0x2d5   :  { %v1725_v3 = vpop.eup %1724  ;;  %1748 = vrcp.f32 %v637_v55  ;;  %v679_v33 = vmul.f32 1.442695, %v665_v24 }
 0x2d6   :  { %1750 = vrcp.f32 %v685_v62  ;;  %v638_v7 = vadd.f32 1.0, %v1725_v3  ;;  %v666_v28 = vsub.f32 0.0, %v544_v14  ;;  %v633_v35 = vmul.f32 1.442695, %v618_v26  ;;  %v1907_v26 = vld [vmem:[#allocation2 + $0x98] sm:$0xff] }
 0x2d7   :  { %v1727_v12 = vpop.eup %1726  ;;  %1752 = vrcp.f32 %v741_v58 }
 0x2d8   :  { %v1729_v18 = vpop.eup %1728  ;;  %1754 = vrcp.f32 %v638_v7  ;;  %v686_v19 = vadd.f32 1.0, %v1727_v12  ;;  %v681_v39 = vmul.f32 1.442695, %v666_v28  ;;  %v1903_v7 = vld [vmem:[#allocation2 + $0x10] sm:$0xff] }
 0x2d9   :  { %v1731_v22 = vpop.eup %1730  ;;  %1756 = vrcp.f32 %v742_v4  ;;  %v745_v57 = vadd.f32 1.0, %v1729_v18  ;;  %v1905_v18 = vld [vmem:[#allocation2 + $0x58] sm:$0xff] }
 0x2da   :  { %v1733_v49 = vpop.eup %1732  ;;  %1758 = vrcp.f32 %v686_v19  ;;  %v743_v59 = vadd.f32 1.0, %v1731_v22 }
 0x2db   :  { %v1735_v27 = vpop.eup %1734  ;;  %1760 = vpow2.f32 %v627_v20  ;;  %v651_v37 = vmul.f32 %v1897_v36, %v1733_v49  ;;  %v1906_v49 = vld [vmem:[#allocation2 + $0x90] sm:$0xff] }
 0x2dc   :  { %v1737_v29 = vpop.eup %1736  ;;  %v699_v31 = vmul.f32 %v1896_v17, %v1735_v27  ;;  %1762 = vpow2.f32 %v675_v23 }
 0x2dd   :  { %v1739_v32 = vpop.eup %1738  ;;  %1764 = vpow2.f32 %v629_v25  ;;  %v755_v40 = vmul.f32 %v1898_v16, %v1737_v29 }
 0x2de   :  { %v1741_v34 = vpop.eup %1740  ;;  %1766 = vpow2.f32 %v677_v15  ;;  %v652_v43 = vmul.f32 %v1899_v42, %v1739_v32  ;;  %v707_v50 = vadd.f32 %v699_v31, %v651_v37 }
 0x2df   :  { %v1743_v38 = vpop.eup %1742  ;;  %1768 = vpow2.f32 %v631_v30  ;;  %v746_v4 = vadd.f32 1.0, %v1741_v34 }
 0x2e0   :  { %v1745_v41 = vpop.eup %1744  ;;  %v700_v46 = vmul.f32 %v1900_v44, %v1743_v38  ;;  %1770 = vpow2.f32 %v679_v33  ;;  %v2350_v62 = vadd.f32 %v755_v40, %v707_v50 }
 0x2e1   :  { %v1747_v51 = vpop.eup %1746  ;;  %v756_v53 = vmul.f32 %v1901_v52, %v1745_v41  ;;  %1772 = vpow2.f32 %v633_v35 }
 0x2e2   :  { %v1749_v54 = vpop.eup %1748  ;;  %v708_v55 = vadd.f32 %v700_v46, %v652_v43  ;;  %1774 = vpow2.f32 %v681_v39  ;;  %v744_v12 = vadd.f32 1.0, %v1747_v51 }
 0x2e3   :  { %v1751_v56 = vpop.eup %1750  ;;  %v653_v8 = vmul.f32 %v1903_v7, %v1749_v54  ;;  %1776 = vrcp.f32 %v745_v57 }
 0x2e4   :  { %v1753_v58 = vpop.eup %1752  ;;  %v764_v63 = vadd.f32 %v756_v53, %v708_v55  ;;  %v701_v2 = vmul.f32 %v1902_v1, %v1751_v56  ;;  %1778 = vrcp.f32 %v743_v59  ;;  %v1908_v53 = vld [vmem:[#allocation2 + $0x20] sm:$0xff]  ;;  %v1910_v1 = vld [vmem:[#allocation2 + $0x28] sm:$0xff] }
 0x2e5   :  { %v1755_v3 = vpop.eup %1754  ;;  %1780 = vrcp.f32 %v746_v4  ;;  %v757_v25 = vmul.f32 %v1906_v49, %v1753_v58  ;;  %v1909_v55 = vld [vmem:[#allocation2 + $0x60] sm:$0xff]  ;;  %v1917_v49 = vld [vmem:[#allocation2 + $0xb0] sm:$0xff] }
 0x2e6   :  { %v1757_v5 = vpop.eup %1756  ;;  %v871_v6 = vpack.c.bf16 %v764_v63, %v2350_v62  ;;  %v654_v14 = vmul.f32 %v1904_v13, %v1755_v3  ;;  %v709_v20 = vadd.f32 %v701_v2, %v653_v8  ;;  %1782 = vrcp.f32 %v744_v12  ;;  %v1911_v3 = vld [vmem:[#allocation2 + $0x68] sm:$0xff] }
 0x2e7   :  { %v1759_v10 = vpop.eup %1758  ;;  %v758_v27 = vmul.f32 %v1907_v26, %v1757_v5  ;;  %v857_v51 = vadd.f32 %v764_v63, %v2350_v62  ;;  %v1913_v12 = vld [vmem:[#allocation2 + $0xa8] sm:$0xff] }
 0x2e8   :  { %1651 = vmatmul.mubr.bf16.vlgmr.msra.gmra.mxu1 %v871_v6  ;;  %v702_v19 = vmul.f32 %v1905_v18, %v1759_v10  ;;  %v1761_v21 = vpop.eup %1760  ;;  %v765_v17 = vadd.f32 %v757_v25, %v709_v20  ;;  %v1912_v6 = vld [vmem:[#allocation2 + $0xa0] sm:$0xff]  ;;  %v1914_v18 = vld [vmem:[#allocation2 + $0x30] sm:$0xff] }
 0x2e9   :  { %1654 = vmatprep.mubr.msk.bf16.mxu1 %vm2017_vm0, %v2016_v0  ;;  %v1763_v22 = vpop.eup %1762  ;;  %v639_v23 = vadd.f32 1.0, %v1761_v21  ;;  %v1915_v20 = vld [vmem:[#allocation2 + $0x70] sm:$0xff] }
 0x2ea   :  { %v710_v24 = vadd.f32 %v702_v19, %v654_v14  ;;  %v1765_v15 = vpop.eup %1764  ;;  %v687_v28 = vadd.f32 1.0, %v1763_v22  ;;  %v858_v58 = vadd.f32 %v857_v51, %v765_v17  ;;  %v1511_v51 = vld [vmem:[%s2470_s2 + $0xd0] sm:$0xff] }
 0x2eb   :  { %v1767_v29 = vpop.eup %1766  ;;  %1784 = vrcp.f32 %v639_v23  ;;  %v640_v30 = vadd.f32 1.0, %v1765_v15  ;;  %v1916_v23 = vld [vmem:[#allocation2 + $0x38] sm:$0xff] }
 0x2ec   :  { %v766_v31 = vadd.f32 %v758_v27, %v710_v24  ;;  %v1769_v32 = vpop.eup %1768  ;;  %1786 = vrcp.f32 %v687_v28  ;;  %v688_v33 = vadd.f32 1.0, %v1767_v29  ;;  %v1918_v15 = vld [vmem:[#allocation2 + $0x78] sm:$0xff] }
 0x2ed   :  { %v1771_v34 = vpop.eup %1770  ;;  %1788 = vrcp.f32 %v640_v30  ;;  %v641_v35 = vadd.f32 1.0, %v1769_v32  ;;  %v1919_v30 = vld [vmem:[#allocation2 + $0xb8] sm:$0xff] }
 0x2ee   :  { %v872_v36 = vpack.c.bf16 %v766_v31, %v765_v17  ;;  %v1773_v37 = vpop.eup %1772  ;;  %1790 = vrcp.f32 %v688_v33  ;;  %v689_v38 = vadd.f32 1.0, %v1771_v34  ;;  %v859_v10 = vadd.f32 %v858_v58, %v766_v31 }
 0x2ef   :  { %v1775_v39 = vpop.eup %1774  ;;  %1792 = vrcp.f32 %v641_v35  ;;  %v642_v16 = vadd.f32 1.0, %v1773_v37 }
 0x2f0   :  { %1655 = vmatmul.mubr.bf16.gmra.mxu1 %v872_v36  ;;  %1794 = vrcp.f32 %v689_v38  ;;  %v690_v40 = vadd.f32 1.0, %v1775_v39  ;;  %v1777_v41 = vpop.eup %1776 }
 0x2f1   :  { %1658 = vmatprep.mubr.msk.bf16.mxu1 %vm2017_vm0, %v2016_v0  ;;  %1796 = vrcp.f32 %v642_v16  ;;  %v1779_v42 = vpop.eup %1778  ;;  %v761_v25 = vmul.f32 %v1917_v49, %v1777_v41 }
 0x2f2   :  { %1798 = vrcp.f32 %v690_v40  ;;  %v1781_v43 = vpop.eup %1780  ;;  %v759_v7 = vmul.f32 %v1912_v6, %v1779_v42 }
 0x2f3   :  { %v1783_v44 = vpop.eup %1782  ;;  %v762_v17 = vmul.f32 %v1919_v30, %v1781_v43 }
 0x2f4   :  { %v760_v13 = vmul.f32 %v1913_v12, %v1783_v44 }
 0x2f8   :  { %v1785_v46 = vpop.eup %1784 }
 0x2f9   :  { %v1787_v50 = vpop.eup %1786  ;;  %v655_v54 = vmul.f32 %v1908_v53, %v1785_v46 }
 0x2fa   :  { %v1789_v52 = vpop.eup %1788  ;;  %v703_v56 = vmul.f32 %v1909_v55, %v1787_v50  ;;  %v1509_v50 = vld [vmem:[%s2470_s2 + $0xc0] sm:$0xff] }
 0x2fb   :  { %v1791_v57 = vpop.eup %1790  ;;  %v656_v2 = vmul.f32 %v1910_v1, %v1789_v52  ;;  %v1506_v52 = vld [vmem:[%s2470_s2 + $0xa8] sm:$0xff]  ;;  %v978_v53 = vpack.c.bf16 %v1511_v51, %v1509_v50  ;;  %v1505_v55 = vld [vmem:[%s2470_s2 + $0xa0] sm:$0xff] }
 0x2fc   :  { %v1793_v59 = vpop.eup %1792  ;;  %v704_v4 = vmul.f32 %v1911_v3, %v1791_v57  ;;  %v711_v5 = vadd.f32 %v703_v56, %v655_v54  ;;  %v1507_v56 = vld [vmem:[%s2470_s2 + $0xb0] sm:$0xff]  ;;  %v1502_v57 = vld [vmem:[%s2470_s2 + $0x88] sm:$0xff] }
 0x2fd   :  { %v1795_v8 = vpop.eup %1794  ;;  %v657_v19 = vmul.f32 %v1914_v18, %v1793_v59  ;;  %1027 = vmatpush1.bf16.msra.mxu0 %v978_v53  ;;  %v976_v58 = vpack.c.bf16 %v1507_v56, %v1505_v55  ;;  %v1504_v59 = vld [vmem:[%s2470_s2 + $0x98] sm:$0xff]  ;;  %v1503_v3 = vld [vmem:[%s2470_s2 + $0x90] sm:$0xff]  ;;  %v851_v56 = vld [vmem:[#allocation5 + $0x2e8] sm:$0xff] }
 0x2fe   :  { %v1797_v62 = vpop.eup %1796  ;;  %v712_v63 = vadd.f32 %v704_v4, %v656_v2  ;;  %v767_v14 = vadd.f32 %v759_v7, %v711_v5  ;;  %v705_v21 = vmul.f32 %v1915_v20, %v1795_v8  ;;  %v975_v1 = vpack.c.bf16 %v1504_v59, %v1502_v57  ;;  %v1501_v2 = vld [vmem:[%s2470_s2 + $0x80] sm:$0xff]  ;;  %v2395_v5 = vld [vmem:[%s2472_s4 + $0xc] sm:$0x77]  ;;  %v849_v53 = vld [vmem:[#allocation5 + $0x2d8] sm:$0xff] }
 0x2ff   :  { %v1799_v22 = vpop.eup %1798  ;;  %v658_v24 = vmul.f32 %v1916_v23, %v1797_v62  ;;  %v974_v4 = vpack.c.bf16 %v1503_v3, %v1501_v2  ;;  %v887_v6 = vrot.slane %v2395_v5, %v2193_v48  ;;  %v846_v59 = vld [vmem:[#allocation5 + $0x2c0] sm:$0xff]  ;;  %v845_v3 = vld [vmem:[#allocation5 + $0x2b8] sm:$0xff] }
 0x300   :  { %v768_v26 = vadd.f32 %v760_v13, %v712_v63  ;;  %v860_v27 = vadd.f32 %v859_v10, %v767_v14  ;;  %v706_v28 = vmul.f32 %v1918_v15, %v1799_v22  ;;  %v713_v29 = vadd.f32 %v705_v21, %v657_v19  ;;  %v842_v2 = vld [vmem:[#allocation5 + $0x2a0] sm:$0xff] }
 0x302   :  { %v861_v31 = vadd.f32 %v860_v27, %v768_v26  ;;  %v873_v32 = vpack.c.bf16 %v768_v26, %v767_v14  ;;  %v714_v33 = vadd.f32 %v706_v28, %v658_v24  ;;  %v769_v34 = vadd.f32 %v761_v25, %v713_v29 }
 0x304   :  { %1659 = vmatmul.mubr.bf16.gmra.mxu1 %v873_v32  ;;  %v770_v35 = vadd.f32 %v762_v17, %v714_v33  ;;  %v862_v36 = vadd.f32 %v861_v31, %v769_v34 }
 0x305   :  { %1662 = vmatprep.mubr.msk.bf16.mxu1 %vm2017_vm0, %v2016_v0 }
 0x306   :  { %v863_v37 = vadd.f32 %v862_v36, %v770_v35  ;;  %v874_v39 = vpack.c.bf16 %v770_v35, %v769_v34 }
 0x308   :  { %v864_v38 = vrot.slane %v863_v37, 4 }
 0x30a   :  { %v865_v16 = vadd.f32 %v864_v38, %v863_v37 }
 0x30c   :  { %1663 = vmatmul.mubr.bf16.gmra.mxu1 %v874_v39  ;;  %v866_v40 = vrot.slane %v865_v16, 2 }
 0x30d   :  { %1666 = vmatprep.mubr.msk.bf16.mxu1 %vm2017_vm0, %v2016_v0  ;;  %v1508_v0 = vld [vmem:[%s2470_s2 + $0xb8] sm:$0xff] }
 0x30e   :  { %v867_v41 = vadd.f32 %v866_v40, %v865_v16  ;;  %v977_v54 = vpack.c.bf16 %v1508_v0, %v1506_v52  ;;  %v852_v0 = vld [vmem:[#allocation5 + $0x2f0] sm:$0xff] }
 0x30f   :  { %v1126_v55 = vpack.c.bf16 %v852_v0, %v849_v53  ;;  %v812_v53 = vld [vmem:[#allocation5 + $0x1b0] sm:$0xff]  ;;  %v815_v0 = vld [vmem:[#allocation5 + $0x1c8] sm:$0xff] }
 0x310   :  { %v868_v42 = vrot.slane %v867_v41, 1  ;;  %1028 = vmatprep.subr.bf16.mxu0 %v977_v54  ;;  %v848_v54 = vld [vmem:[#allocation5 + $0x2d0] sm:$0xff] }
 0x311   :  { %1029 = vmatpush1.bf16.msra.mxu0 %v976_v58  ;;  %v1125_v57 = vpack.c.bf16 %v851_v56, %v848_v54  ;;  %v843_v58 = vld [vmem:[#allocation5 + $0x2a8] sm:$0xff]  ;;  %v814_v56 = vld [vmem:[#allocation5 + $0x1c0] sm:$0xff] }
 0x312   :  { %v869_v43 = vadd.f32 %v868_v42, %v867_v41  ;;  %1030 = vmatprep.subr.bf16.mxu0 %v975_v1  ;;  %v1123_v1 = vpack.c.bf16 %v846_v59, %v843_v58  ;;  %v807_v58 = vld [vmem:[#allocation5 + $0x188] sm:$0xff] }
 0x314   :  { %v870_v44 = vmul.f32 0.015625, %v869_v43 }
 0x315   :  { %1031 = vmatpush1.bf16.msra.mxu0 %v974_v4  ;;  %v1122_v4 = vpack.c.bf16 %v845_v3, %v842_v2  ;;  %v806_v2 = vld [vmem:[#allocation5 + $0x180] sm:$0xff]  ;;  %v809_v3 = vld [vmem:[#allocation5 + $0x198] sm:$0xff] }
 0x316   :  { %v875_v46 = vpack.c.bf16 %v870_v44, %v870_v44  ;;  %1156 = vmatprep.subr.bf16.mxu0 %v1126_v55  ;;  %v1107_v55 = vpack.c.bf16 %v815_v0, %v812_v53 }
 0x318   :  { %1667 = vmatmul.mubr.bf16.gmra.mxu1 %v875_v46 }
 0x3a8   :  { %v922_v7 = vpop.f32.mrf.mxu1 }
 0x3a9   :  { %v923_v10 = vadd.f32 %v922_v7, %v887_v6  ;;  %v853_v7 = vld [vmem:[#allocation5 + $0x2f8] sm:$0xff] }
 0x3aa   :  { %v1652_v8 = vpop.f32.mrf.mxu1 }
 0x3ab   :  { %v960_v63 = vmax.f32 %v923_v10, 0.0  ;;  %v837_v8 = vld [vmem:[#allocation5 + $0x278] sm:$0xff]  ;;  %v840_v10 = vld [vmem:[#allocation5 + $0x290] sm:$0xff] }
 0x3ac   :  { %v925_v12 = vpop.f32.mrf.mxu1 }
 0x3ad   :  { %v926_v13 = vadd.f32 %v925_v12, %v887_v6 }
 0x3ae   :  { %v1653_v62 = vpop.f32.mrf.mxu1 }
 0x3af   :  { %v961_v14 = vmax.f32 %v926_v13, 0.0  ;;  %v836_v13 = vld [vmem:[#allocation5 + $0x270] sm:$0xff]  ;;  %v1120_v62 = vpack.c.bf16 %v840_v10, %v837_v8  ;;  %v811_v8 = vld [vmem:[#allocation5 + $0x1a8] sm:$0xff] }
 0x3b0   :  { %v930_v18 = vpop.f32.mrf.mxu1 }
 0x3b1   :  { %v969_v19 = vpack.c.bf16 %v961_v14, %v960_v63  ;;  %v931_v21 = vadd.f32 %v930_v18, %v887_v6  ;;  %v839_v63 = vld [vmem:[#allocation5 + $0x288] sm:$0xff]  ;;  %v844_v18 = vld [vmem:[#allocation5 + $0x2b0] sm:$0xff] }
 0x3b2   :  { %v1656_v20 = vpop.f32.mrf.mxu1  ;;  %v1119_v14 = vpack.c.bf16 %v839_v63, %v836_v13 }
 0x3b3   :  { %1519 = vmatmul.mubr.msk.bf16.vlgmr.msra.gmra.mxu0 %vm317_vm1, %v969_v19  ;;  %v962_v49 = vmax.f32 %v931_v21, 0.0  ;;  %v847_v19 = vld [vmem:[#allocation5 + $0x2c8] sm:$0xff] }
 0x3b4   :  { %v933_v22 = vpop.f32.mrf.mxu1  ;;  %1056 = vmatprep.mubr.bf16.mxu0 %v2018_v45  ;;  %1157 = vmatpush1.bf16.msra.mxu0 %v1125_v57  ;;  %v1124_v20 = vpack.c.bf16 %v847_v19, %v844_v18  ;;  %v831_v21 = vld [vmem:[#allocation5 + $0x248] sm:$0xff]  ;;  %v817_v57 = vld [vmem:[#allocation5 + $0x1d8] sm:$0xff] }
 0x3b5   :  { %v934_v23 = vadd.f32 %v933_v22, %v887_v6  ;;  %1158 = vmatprep.subr.bf16.mxu0 %v1123_v1  ;;  %v834_v22 = vld [vmem:[#allocation5 + $0x260] sm:$0xff]  ;;  %v1109_v59 = vpack.c.bf16 %v817_v57, %v814_v56  ;;  %v1132_v56 = vrot.slane %v2395_v5, %v2305_v9 }
 0x3b6   :  { %v1657_v24 = vpop.f32.mrf.mxu1  ;;  %v810_v1 = vld [vmem:[#allocation5 + $0x1a0] sm:$0xff] }
 0x3b7   :  { %v963_v25 = vmax.f32 %v934_v23, 0.0  ;;  %v1117_v23 = vpack.c.bf16 %v834_v22, %v831_v21  ;;  %v830_v24 = vld [vmem:[#allocation5 + $0x240] sm:$0xff] }
 0x3b8   :  { %1159 = vmatpush1.bf16.msra.mxu0 %v1122_v4  ;;  %v1105_v4 = vpack.c.bf16 %v810_v1, %v807_v58  ;;  %v1136_v58 = vrot.slane %v2395_v5, %v452_v11 }
 0x3b9   :  { %v970_v26 = vpack.c.bf16 %v963_v25, %v962_v49  ;;  %1160 = vmatprep.subr.bf16.mxu0 %v1120_v62  ;;  %v833_v49 = vld [vmem:[#allocation5 + $0x258] sm:$0xff] }
 0x3ba   :  { %v1116_v25 = vpack.c.bf16 %v833_v49, %v830_v24 }
 0x3bb   :  { %1520 = vmatmul.mubr.msk.bf16.gmra.mxu0 %vm317_vm1, %v970_v26  ;;  %v838_v26 = vld [vmem:[#allocation5 + $0x280] sm:$0xff] }
 0x3bc   :  { %1064 = vmatprep.mubr.bf16.mxu0 %v2018_v45  ;;  %1161 = vmatpush1.bf16.msra.mxu0 %v1119_v14 }
 0x3bd   :  { %1162 = vmatprep.subr.bf16.mxu0 %v1117_v23 }
 0x3c0   :  { %1163 = vmatpush1.bf16.msra.mxu0 %v1116_v25 }
 0x3c4   :  { %v938_v27 = vpop.f32.mrf.mxu1 }
 0x3c5   :  { %v939_v28 = vadd.f32 %v938_v27, %v887_v6  ;;  %v841_v27 = vld [vmem:[#allocation5 + $0x298] sm:$0xff] }
 0x3c6   :  { %v1660_v15 = vpop.f32.mrf.mxu1 }
 0x3c7   :  { %v964_v31 = vmax.f32 %v939_v28, 0.0  ;;  %v1121_v15 = vpack.c.bf16 %v841_v27, %v838_v26  ;;  %v825_v28 = vld [vmem:[#allocation5 + $0x218] sm:$0xff]  ;;  %v990_v26 = vrot.slane %v2395_v5, %v305_v60  ;;  %v986_v27 = vrot.slane %v2395_v5, %v2215_v61 }
 0x3c8   :  { %v941_v29 = vpop.f32.mrf.mxu1 }
 0x3c9   :  { %v942_v30 = vadd.f32 %v941_v29, %v887_v6  ;;  %v828_v29 = vld [vmem:[#allocation5 + $0x230] sm:$0xff] }
 0x3ca   :  { %v1661_v17 = vpop.f32.mrf.mxu1 }
 0x3cb   :  { %v965_v32 = vmax.f32 %v942_v30, 0.0  ;;  %v824_v30 = vld [vmem:[#allocation5 + $0x210] sm:$0xff]  ;;  %v1114_v17 = vpack.c.bf16 %v828_v29, %v825_v28  ;;  %v1000_v29 = vrot.slane %v990_v26, %v2215_v61 }
 0x3cc   :  { %v946_v33 = vpop.f32.mrf.mxu1 }
 0x3cd   :  { %v971_v34 = vpack.c.bf16 %v965_v32, %v964_v31  ;;  %v947_v36 = vadd.f32 %v946_v33, %v887_v6  ;;  %v827_v31 = vld [vmem:[#allocation5 + $0x228] sm:$0xff]  ;;  %v832_v33 = vld [vmem:[#allocation5 + $0x250] sm:$0xff]  ;;  %1164 = vmatprep.subr.bf16.mxu0 %v1114_v17 }
 0x3ce   :  { %v1664_v35 = vpop.f32.mrf.mxu1  ;;  %v1113_v32 = vpack.c.bf16 %v827_v31, %v824_v30  ;;  %v996_v30 = vrot.slane %v986_v27, %v2215_v61 }
 0x3cf   :  { %1521 = vmatmul.mubr.msk.bf16.gmra.mxu0 %vm317_vm1, %v971_v34  ;;  %v966_v16 = vmax.f32 %v947_v36, 0.0  ;;  %v835_v34 = vld [vmem:[#allocation5 + $0x268] sm:$0xff] }
 0x3d0   :  { %v949_v37 = vpop.f32.mrf.mxu1  ;;  %1072 = vmatprep.mubr.bf16.mxu0 %v2018_v45  ;;  %v1118_v35 = vpack.c.bf16 %v835_v34, %v832_v33  ;;  %1165 = vmatpush1.bf16.msra.mxu0 %v1113_v32  ;;  %v819_v36 = vld [vmem:[#allocation5 + $0x1e8] sm:$0xff] }
 0x3d1   :  { %v950_v38 = vadd.f32 %v949_v37, %v887_v6  ;;  %v822_v37 = vld [vmem:[#allocation5 + $0x200] sm:$0xff] }
 0x3d2   :  { %v1665_v39 = vpop.f32.mrf.mxu1 }
 0x3d3   :  { %v967_v40 = vmax.f32 %v950_v38, 0.0  ;;  %v818_v38 = vld [vmem:[#allocation5 + $0x1e0] sm:$0xff]  ;;  %v1111_v39 = vpack.c.bf16 %v822_v37, %v819_v36 }
 0x3d5   :  { %v972_v41 = vpack.c.bf16 %v967_v40, %v966_v16  ;;  %v821_v16 = vld [vmem:[#allocation5 + $0x1f8] sm:$0xff]  ;;  %v826_v40 = vld [vmem:[#allocation5 + $0x220] sm:$0xff]  ;;  %1166 = vmatprep.subr.bf16.mxu0 %v1111_v39 }
 0x3d7   :  { %1522 = vmatmul.mubr.msk.bf16.gmra.mxu0 %vm317_vm1, %v972_v41  ;;  %v829_v41 = vld [vmem:[#allocation5 + $0x238] sm:$0xff] }
 0x3d8   :  { %v954_v42 = vpop.f32.mrf.mxu1  ;;  %1080 = vmatprep.mubr.bf16.mxu0 %v2018_v45 }
 0x3d9   :  { %v955_v43 = vadd.f32 %v954_v42, %v887_v6  ;;  %v850_v6 = vld [vmem:[#allocation5 + $0x2e0] sm:$0xff]  ;;  %v1110_v42 = vpack.c.bf16 %v821_v16, %v818_v38 }
 0x3da   :  { %v1668_v44 = vpop.f32.mrf.mxu1  ;;  %v1127_v12 = vpack.c.bf16 %v853_v7, %v850_v6  ;;  %v1104_v6 = vpack.c.bf16 %v809_v3, %v806_v2  ;;  %v808_v7 = vld [vmem:[#allocation5 + $0x190] sm:$0xff] }
 0x3db   :  { %v968_v46 = vmax.f32 %v955_v43, 0.0  ;;  %v1115_v43 = vpack.c.bf16 %v829_v41, %v826_v40  ;;  %v813_v44 = vld [vmem:[#allocation5 + $0x1b8] sm:$0xff]  ;;  %1167 = vmatpush1.bf16.msra.mxu0 %v1110_v42  ;;  %v1106_v10 = vpack.c.bf16 %v811_v8, %v808_v7 }
 0x3dc   :  { %v957_v50 = vpop.f32.mrf.mxu1  ;;  %1670 = vmatprep.subr.bf16.mxu1 %v1127_v12 }
 0x3dd   :  { %v973_v51 = vpack.c.bf16 %v968_v46, %v968_v46  ;;  %1671 = vmatpush3.bf16.msra.mxu1 %v1127_v12  ;;  %v816_v46 = vld [vmem:[#allocation5 + $0x1d0] sm:$0xff] }
 0x3de   :  { %v1669_v52 = vpop.f32.mrf.mxu1  ;;  %1672 = vmatprep.subr.bf16.mxu1 %v1124_v20  ;;  %v820_v50 = vld [vmem:[#allocation5 + $0x1f0] sm:$0xff] }
 0x3df   :  { %1523 = vmatmul.mubr.msk.bf16.gmra.mxu0 %vm317_vm1, %v973_v51  ;;  %v1108_v51 = vpack.c.bf16 %v816_v46, %v813_v44  ;;  %v823_v52 = vld [vmem:[#allocation5 + $0x208] sm:$0xff] }
 0x3e0   :  { %1188 = vmatprep.mubr.bf16.mxu0 %v2018_v45  ;;  %v1112_v54 = vpack.c.bf16 %v823_v52, %v820_v50 }
 0x3e1   :  { %1673 = vmatpush3.bf16.msra.mxu1 %v1124_v20  ;;  %1168 = vmatprep.subr.bf16.mxu0 %v1108_v51 }
 0x3e2   :  { %1674 = vmatprep.subr.bf16.mxu1 %v1121_v15  ;;  %1169 = vmatpush1.bf16.msra.mxu0 %v1107_v55  ;;  %v1518_v55 = vld [vmem:[%s2472_s4 + $0x14] sm:$0x7]  ;;  %s2019_s4 = smov [#allocation7]  }
 0x3e3   :  { %1170 = vmatprep.subr.bf16.mxu0 %v1105_v4  ;;  %v1140_v57 = vrot.slane %v1518_v55, %v2305_v9  ;;  %s1467_s13 = sshll.u32 %s2019_s4, 4  ;;  %s1468_s13 = int_to_ptr.vmem [resolvable:$true] %s1467_s13 }
 0x3e4   :  { %s1984_s14 = scalar_lea.vmem %s1468_s13, 1024  ;;  %p1989_p11 = scmp.lt.s32.totalorder %s1468_s13, %s1468_s13 }
 0x3e5   :  { %1675 = vmatpush3.bf16.msra.mxu1 %v1121_v15  ;;  %v2433_v1 = vrot.slane %v1140_v57, %v2305_v9  ;;  %p1985_p10 = scmp.ne.s32.totalorder %s1468_s13, %s1984_s14  ;;  %p1990_p12 = scmp.lt.s32.totalorder %s1984_s14, %s1984_s14 }
 0x3e6   :  { %1676 = vmatprep.subr.bf16.mxu1 %v1118_v35  ;;  %1171 = vmatpush1.bf16.msra.mxu0 %v1104_v6 }
 0x3e7   :  { %p1991_p13 = por %p1990_p12, %p1989_p11 }
 0x3e9   :  { %1677 = vmatpush3.bf16.msra.mxu1 %v1118_v35  ;;  %p1992_p0 = pnand %p1991_p13, %p1985_p10 }
 0x3ea   :  { %1678 = vmatprep.subr.bf16.mxu1 %v1115_v43 }
 0x3ed   :  { %1679 = vmatpush3.bf16.msra.mxu1 %v1115_v43 }
 0x3ee   :  { %1680 = vmatprep.subr.bf16.mxu1 %v1112_v54 }
 0x3f1   :  { %1681 = vmatpush3.bf16.msra.mxu1 %v1112_v54 }
 0x3f2   :  { %1682 = vmatprep.subr.bf16.mxu1 %v1109_v59 }
 0x3f5   :  { %1683 = vmatpush3.bf16.msra.mxu1 %v1109_v59  ;;  %v2430_v59 = vrot.slane %v1132_v56, %v2305_v9 }
 0x3f6   :  { %1684 = vmatprep.subr.bf16.mxu1 %v1106_v10 }
 0x3f9   :  { %1685 = vmatpush3.bf16.msra.mxu1 %v1106_v10 }
 0x473   :  { %v1050_v12 = vpop.f32.mrf.mxu0 }
 0x474   :  { %v1051_v33 = vadd.f32 %v1050_v12, %v996_v30 }
 0x475   :  { %v1052_v13 = vpop.f32.mrf.mxu0 }
 0x477   :  { %v1053_v62 = vpop.f32.mrf.mxu0 }
 0x478   :  { %v1054_v35 = vadd.f32 %v1053_v62, %v996_v30 }
 0x479   :  { %v1055_v63 = vpop.f32.mrf.mxu0 }
 0x47b   :  { %v1058_v14 = vpop.f32.mrf.mxu0 }
 0x47c   :  { %v1059_v36 = vadd.f32 %v1058_v14, %v996_v30 }
 0x47d   :  { %v1060_v18 = vpop.f32.mrf.mxu0 }
 0x47f   :  { %v1061_v19 = vpop.f32.mrf.mxu0 }
 0x480   :  { %v1062_v37 = vadd.f32 %v1061_v19, %v996_v30 }
 0x481   :  { %v1063_v20 = vpop.f32.mrf.mxu0 }
 0x48f   :  { %v1066_v21 = vpop.f32.mrf.mxu0 }
 0x490   :  { %v1067_v60 = vadd.f32 %v1066_v21, %v996_v30 }
 0x491   :  { %v1068_v22 = vpop.f32.mrf.mxu0 }
 0x493   :  { %v1069_v23 = vpop.f32.mrf.mxu0 }
 0x494   :  { %v1070_v39 = vadd.f32 %v1069_v23, %v996_v30 }
 0x495   :  { %v1071_v24 = vpop.f32.mrf.mxu0 }
 0x497   :  { %v1074_v49 = vpop.f32.mrf.mxu0 }
 0x498   :  { %v1075_v52 = vadd.f32 %v1074_v49, %v996_v30 }
 0x499   :  { %v1076_v25 = vpop.f32.mrf.mxu0 }
 0x49b   :  { %v1077_v15 = vpop.f32.mrf.mxu0 }
 0x49c   :  { %v1078_v53 = vadd.f32 %v1077_v15, %v996_v30 }
 0x49d   :  { %v1079_v28 = vpop.f32.mrf.mxu0 }
 0x49f   :  { %v1082_v17 = vpop.f32.mrf.mxu0 }
 0x4a1   :  { %v1083_v31 = vpop.f32.mrf.mxu0 }
 0x4a2   :  { %v1084_v32 = vadd.f32 %v1083_v31, %v1000_v29 }
 0x4a3   :  { %v1085_v34 = vpop.f32.mrf.mxu0 }
 0x4a4   :  { %v1091_v38 = vrot.slane %v1084_v32, %v2193_v48 }
 0x4a5   :  { %v1086_v16 = vpop.f32.mrf.mxu0 }
 0x4a6   :  { %v1092_v40 = vadd.f32 %v1091_v38, %v1051_v33  ;;  %v1093_v41 = vadd.f32 %v1091_v38, %v1054_v35  ;;  %v1094_v42 = vadd.f32 %v1091_v38, %v1059_v36  ;;  %v1095_v43 = vadd.f32 %v1091_v38, %v1062_v37 }
 0x4a7   :  { %v1096_v44 = vadd.f32 %v1091_v38, %v1067_v60  ;;  %v1097_v46 = vadd.f32 %v1091_v38, %v1070_v39  ;;  %v1098_v48 = vadd.f32 %v1091_v38, %v1075_v52  ;;  %v1099_v0 = vadd.f32 %v1091_v38, %v1078_v53 }
 0x4a8   :  { %v1100_v61 = vpack.c.bf16 %v1093_v41, %v1092_v40  ;;  %v1101_v50 = vpack.c.bf16 %v1095_v43, %v1094_v42 }
 0x4a9   :  { %v1102_v51 = vpack.c.bf16 %v1097_v46, %v1096_v44  ;;  %v1103_v54 = vpack.c.bf16 %v1099_v0, %v1098_v48 }
 0x4aa   :  { %1189 = vmatmul.mubr.bf16.vlgmr.msra.gmra.mxu0 %v1100_v61  ;;  %1686 = vmatprep.mubr.bf16.mxu1 %v1100_v61 }
 0x4ab   :  { %1687 = vmatmul.mubr.bf16.vlgmr.msra.gmra.mxu1 %v1101_v50  ;;  %1198 = vmatprep.mubr.bf16.mxu0 %v2018_v45 }
 0x4ac   :  { %1690 = vmatprep.mubr.bf16.mxu1 %v1102_v51 }
 0x4b2   :  { %1199 = vmatmul.mubr.bf16.gmra.mxu0 %v1101_v50 }
 0x4b3   :  { %1691 = vmatmul.mubr.bf16.gmra.mxu1 %v1103_v54  ;;  %1208 = vmatprep.mubr.bf16.mxu0 %v2018_v45 }
 0x4ba   :  { %1209 = vmatmul.mubr.bf16.gmra.mxu0 %v1102_v51 }
 0x4bb   :  { %1218 = vmatprep.mubr.bf16.mxu0 %v2018_v45  ;;  %v2436_v45 = vrot.slane %v1136_v58, %v2305_v9 }
 0x4c2   :  { %1219 = vmatmul.mubr.bf16.gmra.mxu0 %v1103_v54 }
 0x56a   :  { %v1190_v2 = vpop.f32.mrf.mxu0 }
 0x56b   :  { %v1191_v3 = vadd.f32 %v1190_v2, %v2430_v59  ;;  %v1688_v4 = vpop.f32.mrf.mxu1 }
 0x56c   :  { %v1272_v6 = vadd.f32 %v1688_v4, %v2433_v1  ;;  %v1192_v7 = vpop.f32.mrf.mxu0 }
 0x56d   :  { %v1294_v8 = vsub.f32 0.0, %v1191_v3  ;;  %v1193_v47 = vadd.f32 %v1192_v7, %v2436_v45  ;;  %v1263_v11 = vpop.f32.mrf.mxu1 }
 0x56e   :  { %v1400_v5 = vsub.f32 0.0, %v1272_v6  ;;  %v1264_v10 = vadd.f32 %v1263_v11, %v2433_v1  ;;  %v1194_v12 = vpop.f32.mrf.mxu0 }
 0x56f   :  { %v1302_v13 = vmul.f32 1.442695, %v1294_v8  ;;  %v1342_v62 = vsub.f32 0.0, %v1193_v47  ;;  %v1195_v9 = vadd.f32 %v1194_v12, %v2430_v59  ;;  %v1689_v63 = vpop.f32.mrf.mxu1 }
 0x570   :  { %v1398_v14 = vsub.f32 0.0, %v1264_v10  ;;  %v1275_v18 = vadd.f32 %v1689_v63, %v2433_v1  ;;  %v1196_v19 = vpop.f32.mrf.mxu0  ;;  %v1410_v24 = vmul.f32 1.442695, %v1400_v5 }
 0x571   :  { %1800 = vpow2.f32 %v1302_v13  ;;  %v1350_v20 = vmul.f32 1.442695, %v1342_v62  ;;  %v1295_v21 = vsub.f32 0.0, %v1195_v9  ;;  %v1197_v22 = vadd.f32 %v1196_v19, %v2436_v45  ;;  %v1266_v23 = vpop.f32.mrf.mxu1 }
 0x572   :  { %v1406_v49 = vmul.f32 1.442695, %v1398_v14  ;;  %v1401_v25 = vsub.f32 0.0, %v1275_v18  ;;  %v1267_v26 = vadd.f32 %v1266_v23, %v2433_v1  ;;  %v1200_v27 = vpop.f32.mrf.mxu0 }
 0x573   :  { %1802 = vpow2.f32 %v1350_v20  ;;  %v1304_v15 = vmul.f32 1.442695, %v1295_v21  ;;  %v1343_v28 = vsub.f32 0.0, %v1197_v22  ;;  %v1201_v29 = vadd.f32 %v1200_v27, %v2430_v59  ;;  %v1692_v30 = vpop.f32.mrf.mxu1 }
 0x574   :  { %1804 = vpow2.f32 %v1406_v49  ;;  %v1399_v17 = vsub.f32 0.0, %v1267_v26  ;;  %v1288_v31 = vadd.f32 %v1692_v30, %v2433_v1  ;;  %v1202_v32 = vpop.f32.mrf.mxu0  ;;  %v1412_v37 = vmul.f32 1.442695, %v1401_v25 }
 0x575   :  { %1806 = vpow2.f32 %v1304_v15  ;;  %v1352_v33 = vmul.f32 1.442695, %v1343_v28  ;;  %v1296_v34 = vsub.f32 0.0, %v1201_v29  ;;  %v1203_v35 = vadd.f32 %v1202_v32, %v2436_v45  ;;  %v1279_v36 = vpop.f32.mrf.mxu1 }
 0x576   :  { %1808 = vpow2.f32 %v1410_v24  ;;  %v1408_v38 = vmul.f32 1.442695, %v1399_v17  ;;  %v1280_v60 = vadd.f32 %v1279_v36, %v2433_v1  ;;  %v1204_v39 = vpop.f32.mrf.mxu0  ;;  %v1404_v43 = vsub.f32 0.0, %v1288_v31 }
 0x577   :  { %1810 = vpow2.f32 %v1352_v33  ;;  %v1306_v16 = vmul.f32 1.442695, %v1296_v34  ;;  %v1344_v40 = vsub.f32 0.0, %v1203_v35  ;;  %v1205_v41 = vadd.f32 %v1204_v39, %v2430_v59  ;;  %v1693_v42 = vpop.f32.mrf.mxu1 }
 0x578   :  { %1812 = vpow2.f32 %v1408_v38  ;;  %v1206_v44 = vpop.f32.mrf.mxu0  ;;  %v1402_v51 = vsub.f32 0.0, %v1280_v60  ;;  %v1291_v52 = vadd.f32 %v1693_v42, %v2433_v1  ;;  %v1418_v54 = vmul.f32 1.442695, %v1404_v43 }
 0x579   :  { %1814 = vpow2.f32 %v1306_v16  ;;  %v1354_v46 = vmul.f32 1.442695, %v1344_v40  ;;  %v1297_v61 = vsub.f32 0.0, %v1205_v41  ;;  %v1207_v50 = vadd.f32 %v1206_v44, %v2436_v45  ;;  %v1282_v57 = vpop.f32.mrf.mxu1 }
 0x57a   :  { %1816 = vpow2.f32 %v1412_v37  ;;  %v1210_v53 = vpop.f32.mrf.mxu0  ;;  %v1414_v2 = vmul.f32 1.442695, %v1402_v51  ;;  %v1405_v3 = vsub.f32 0.0, %v1291_v52  ;;  %v1283_v8 = vadd.f32 %v1282_v57, %v2433_v1 }
 0x57b   :  { %1818 = vpow2.f32 %v1354_v46  ;;  %v1308_v48 = vmul.f32 1.442695, %v1297_v61  ;;  %v1345_v0 = vsub.f32 0.0, %v1207_v50  ;;  %v1211_v1 = vadd.f32 %v1210_v53, %v2430_v59 }
 0x57c   :  { %v1212_v55 = vpop.f32.mrf.mxu0  ;;  %v1420_v13 = vmul.f32 1.442695, %v1405_v3  ;;  %v1403_v18 = vsub.f32 0.0, %v1283_v8 }
 0x57d   :  { %1820 = vpow2.f32 %v1308_v48  ;;  %v1356_v56 = vmul.f32 1.442695, %v1345_v0  ;;  %v1213_v49 = vadd.f32 %v1212_v55, %v2436_v45  ;;  %v1298_v31 = vsub.f32 0.0, %v1211_v1 }
 0x57e   :  { %v1801_v58 = vpop.eup %1800  ;;  %v1214_v4 = vpop.f32.mrf.mxu0  ;;  %v1416_v29 = vmul.f32 1.442695, %v1403_v18 }
 0x57f   :  { %v1318_v6 = vadd.f32 1.0, %v1801_v58  ;;  %1822 = vpow2.f32 %v1356_v56  ;;  %v1215_v15 = vadd.f32 %v1214_v4, %v2430_v59  ;;  %v1346_v36 = vsub.f32 0.0, %v1213_v49  ;;  %v1920_v56 = vld [vmem:[#allocation2] sm:$0xff]  ;;  %v1926_v49 = vld [vmem:[#allocation2 + $0x10] sm:$0xff] }
 0x580   :  { %v1803_v7 = vpop.eup %1802  ;;  %1824 = vpow2.f32 %v1418_v54  ;;  %v1216_v47 = vpop.f32.mrf.mxu0  ;;  %v1310_v44 = vmul.f32 1.442695, %v1298_v31  ;;  %v1922_v4 = vld [vmem:[#allocation2 + $0x80] sm:$0xff] }
 0x581   :  { %v1805_v11 = vpop.eup %1804  ;;  %1826 = vrcp.f32 %v1318_v6  ;;  %v1366_v5 = vadd.f32 1.0, %v1803_v7  ;;  %v1217_v30 = vadd.f32 %v1216_v47, %v2436_v45  ;;  %v1299_v60 = vsub.f32 0.0, %v1215_v15 }
 0x582   :  { %v1807_v10 = vpop.eup %1806  ;;  %v1422_v12 = vadd.f32 1.0, %v1805_v11  ;;  %1828 = vpow2.f32 %v1414_v2  ;;  %v1220_v62 = vpop.f32.mrf.mxu0  ;;  %v1358_v50 = vmul.f32 1.442695, %v1346_v36 }
 0x583   :  { %v1809_v9 = vpop.eup %1808  ;;  %1830 = vrcp.f32 %v1366_v5  ;;  %v1319_v63 = vadd.f32 1.0, %v1807_v10  ;;  %v1221_v32 = vadd.f32 %v1220_v62, %v2430_v59  ;;  %v1347_v40 = vsub.f32 0.0, %v1217_v30  ;;  %v1923_v62 = vld [vmem:[#allocation2 + $0x8] sm:$0xff] }
 0x584   :  { %v1811_v14 = vpop.eup %1810  ;;  %1832 = vrcp.f32 %v1422_v12  ;;  %v1222_v19 = vpop.f32.mrf.mxu0  ;;  %v1424_v23 = vadd.f32 1.0, %v1809_v9  ;;  %v1312_v53 = vmul.f32 1.442695, %v1299_v60  ;;  %v1930_v60 = vld [vmem:[#allocation2 + $0x58] sm:$0xff] }
 0x585   :  { %v1813_v20 = vpop.eup %1812  ;;  %1834 = vrcp.f32 %v1319_v63  ;;  %v1367_v21 = vadd.f32 1.0, %v1811_v14  ;;  %v1223_v37 = vadd.f32 %v1222_v19, %v2436_v45  ;;  %v1300_v46 = vsub.f32 0.0, %v1221_v32  ;;  %v1924_v63 = vld [vmem:[#allocation2 + $0x48] sm:$0xff] }
 0x586   :  { %v1815_v22 = vpop.eup %1814  ;;  %v1423_v24 = vadd.f32 1.0, %v1813_v20  ;;  %1836 = vpow2.f32 %v1420_v13  ;;  %v1224_v25 = vpop.f32.mrf.mxu0  ;;  %v1925_v19 = vld [vmem:[#allocation2 + $0x88] sm:$0xff] }
 0x587   :  { %v1817_v26 = vpop.eup %1816  ;;  %1838 = vrcp.f32 %v1367_v21  ;;  %v1320_v27 = vadd.f32 1.0, %v1815_v22  ;;  %v1225_v39 = vadd.f32 %v1224_v25, %v2430_v59  ;;  %v1348_v51 = vsub.f32 0.0, %v1223_v37  ;;  %v1929_v37 = vld [vmem:[#allocation2 + $0x18] sm:$0xff] }
 0x588   :  { %v1819_v28 = vpop.eup %1818  ;;  %1840 = vrcp.f32 %v1423_v24  ;;  %v1226_v33 = vpop.f32.mrf.mxu0  ;;  %v1425_v35 = vadd.f32 1.0, %v1817_v26  ;;  %v1360_v59 = vmul.f32 1.442695, %v1347_v40  ;;  %v1314_v2 = vmul.f32 1.442695, %v1300_v46 }
 0x589   :  { %1842 = vrcp.f32 %v1320_v27  ;;  %v1368_v17 = vadd.f32 1.0, %v1819_v28  ;;  %v1227_v41 = vadd.f32 %v1226_v33, %v2436_v45  ;;  %v1301_v48 = vsub.f32 0.0, %v1225_v39  ;;  %v1921_v45 = vld [vmem:[#allocation2 + $0x40] sm:$0xff]  ;;  %v1927_v27 = vld [vmem:[#allocation2 + $0x50] sm:$0xff] }
 0x58a   :  { %v1821_v34 = vpop.eup %1820  ;;  %1844 = vrcp.f32 %v1424_v23  ;;  %v1362_v7 = vmul.f32 1.442695, %v1348_v51 }
 0x58b   :  { %1846 = vrcp.f32 %v1368_v17  ;;  %v1321_v38 = vadd.f32 1.0, %v1821_v34  ;;  %v1349_v54 = vsub.f32 0.0, %v1227_v41  ;;  %v1316_v11 = vmul.f32 1.442695, %v1301_v48  ;;  %v1928_v17 = vld [vmem:[#allocation2 + $0x90] sm:$0xff]  ;;  %v1931_v41 = vld [vmem:[#allocation2 + $0x98] sm:$0xff] }
 0x58c   :  { %v1823_v16 = vpop.eup %1822  ;;  %1848 = vpow2.f32 %v1416_v29 }
 0x58d   :  { %v1825_v42 = vpop.eup %1824  ;;  %1850 = vrcp.f32 %v1321_v38  ;;  %v1369_v43 = vadd.f32 1.0, %v1823_v16  ;;  %v1364_v10 = vmul.f32 1.442695, %v1349_v54 }
 0x58e   :  { %v1827_v61 = vpop.eup %1826  ;;  %1852 = vrcp.f32 %v1425_v35  ;;  %v1428_v26 = vadd.f32 1.0, %v1825_v42 }
 0x58f   :  { %v1829_v52 = vpop.eup %1828  ;;  %1854 = vrcp.f32 %v1369_v43  ;;  %v1334_v57 = vmul.f32 %v1920_v56, %v1827_v61 }
 0x590   :  { %v1831_v0 = vpop.eup %1830  ;;  %1856 = vpow2.f32 %v1310_v44  ;;  %v1426_v29 = vadd.f32 1.0, %v1829_v52 }
 0x591   :  { %v1833_v55 = vpop.eup %1832  ;;  %v1382_v58 = vmul.f32 %v1921_v45, %v1831_v0  ;;  %1858 = vpow2.f32 %v1358_v50 }
 0x592   :  { %v1835_v3 = vpop.eup %1834  ;;  %v1438_v6 = vmul.f32 %v1922_v4, %v1833_v55  ;;  %1860 = vpow2.f32 %v1312_v53 }
 0x593   :  { %v1837_v8 = vpop.eup %1836  ;;  %v1390_v47 = vadd.f32 %v1382_v58, %v1334_v57  ;;  %1862 = vpow2.f32 %v1360_v59  ;;  %v1335_v9 = vmul.f32 %v1923_v62, %v1835_v3  ;;  %v1934_v62 = vld [vmem:[#allocation2 + $0xa0] sm:$0xff] }
 0x594   :  { %v1839_v5 = vpop.eup %1838  ;;  %1864 = vpow2.f32 %v1314_v2  ;;  %v1429_v33 = vadd.f32 1.0, %v1837_v8 }
 0x595   :  { %v1841_v12 = vpop.eup %1840  ;;  %v1446_v13 = vadd.f32 %v1438_v6, %v1390_v47  ;;  %v1383_v14 = vmul.f32 %v1924_v63, %v1839_v5  ;;  %1866 = vpow2.f32 %v1362_v7  ;;  %v1932_v47 = vld [vmem:[#allocation2 + $0x20] sm:$0xff] }
 0x596   :  { %v1843_v18 = vpop.eup %1842  ;;  %v1439_v20 = vmul.f32 %v1925_v19, %v1841_v12  ;;  %1868 = vpow2.f32 %v1316_v11  ;;  %v1933_v5 = vld [vmem:[#allocation2 + $0x60] sm:$0xff]  ;;  %v1936_v19 = vld [vmem:[#allocation2 + $0x68] sm:$0xff] }
 0x597   :  { %v1845_v21 = vpop.eup %1844  ;;  %1454 = vst [vmem:[#allocation7] sm:$0xff] %v1446_v13  ;;  %v1391_v1 = vadd.f32 %v1383_v14, %v1335_v9  ;;  %1870 = vpow2.f32 %v1364_v10  ;;  %v1336_v25 = vmul.f32 %v1926_v49, %v1843_v18  ;;  %v1935_v14 = vld [vmem:[#allocation2 + $0x28] sm:$0xff] }
 0x598   :  { %v1847_v22 = vpop.eup %1846  ;;  %v1440_v31 = vmul.f32 %v1928_v17, %v1845_v21  ;;  %1872 = vrcp.f32 %v1428_v26 }
 0x599   :  { %v1849_v23 = vpop.eup %1848  ;;  %v1447_v24 = vadd.f32 %v1439_v20, %v1391_v1  ;;  %v1384_v15 = vmul.f32 %v1927_v27, %v1847_v22  ;;  %1874 = vrcp.f32 %v1426_v29  ;;  %v1937_v1 = vld [vmem:[#allocation2 + $0xa8] sm:$0xff]  ;;  %v1939_v27 = vld [vmem:[#allocation2 + $0x70] sm:$0xff] }
 0x59a   :  { %v1851_v28 = vpop.eup %1850  ;;  %v1427_v35 = vadd.f32 1.0, %v1849_v23  ;;  %1876 = vrcp.f32 %v1429_v33  ;;  %v1940_v29 = vld [vmem:[#allocation2 + $0xb0] sm:$0xff] }
 0x59b   :  { %v1853_v30 = vpop.eup %1852  ;;  %1455 = vst [vmem:[#allocation7 + $0x8] sm:$0xff] %v1447_v24  ;;  %v1392_v32 = vadd.f32 %v1384_v15, %v1336_v25  ;;  %v1337_v38 = vmul.f32 %v1929_v37, %v1851_v28  ;;  %v1938_v25 = vld [vmem:[#allocation2 + $0x30] sm:$0xff] }
 0x59c   :  { %v1855_v34 = vpop.eup %1854  ;;  %v1441_v42 = vmul.f32 %v1931_v41, %v1853_v30  ;;  %1878 = vrcp.f32 %v1427_v35 }
 0x59d   :  { %v1448_v36 = vadd.f32 %v1440_v31, %v1392_v32  ;;  %v1385_v39 = vmul.f32 %v1930_v60, %v1855_v34  ;;  %v1857_v16 = vpop.eup %1856  ;;  %v1941_v32 = vld [vmem:[#allocation2 + $0x38] sm:$0xff] }
 0x59e   :  { %v1859_v40 = vpop.eup %1858  ;;  %v1322_v44 = vadd.f32 1.0, %v1857_v16  ;;  %v1942_v34 = vld [vmem:[#allocation2 + $0x78] sm:$0xff] }
 0x59f   :  { %1456 = vst [vmem:[#allocation7 + $0x10] sm:$0xff] %v1448_v36  ;;  %v1393_v43 = vadd.f32 %v1385_v39, %v1337_v38  ;;  %v1861_v46 = vpop.eup %1860  ;;  %v1370_v61 = vadd.f32 1.0, %v1859_v40  ;;  %v1943_v36 = vld [vmem:[#allocation2 + $0xb8] sm:$0xff] }
 0x5a0   :  { %v1863_v50 = vpop.eup %1862  ;;  %1880 = vrcp.f32 %v1322_v44  ;;  %v1323_v52 = vadd.f32 1.0, %v1861_v46 }
 0x5a1   :  { %v1449_v51 = vadd.f32 %v1441_v42, %v1393_v43  ;;  %v1865_v53 = vpop.eup %1864  ;;  %1882 = vrcp.f32 %v1370_v61  ;;  %v1371_v48 = vadd.f32 1.0, %v1863_v50 }
 0x5a2   :  { %v1867_v0 = vpop.eup %1866  ;;  %1884 = vrcp.f32 %v1323_v52  ;;  %v1324_v59 = vadd.f32 1.0, %v1865_v53 }
 0x5a3   :  { %1457 = vst [vmem:[#allocation7 + $0x18] sm:$0xff] %v1449_v51  ;;  %v1869_v54 = vpop.eup %1868  ;;  %1886 = vrcp.f32 %v1371_v48  ;;  %v1372_v55 = vadd.f32 1.0, %v1867_v0 }
 0x5a4   :  { %v1871_v56 = vpop.eup %1870  ;;  %1888 = vrcp.f32 %v1324_v59  ;;  %v1325_v57 = vadd.f32 1.0, %v1869_v54 }
 0x5a5   :  { %1890 = vrcp.f32 %v1372_v55  ;;  %v1373_v45 = vadd.f32 1.0, %v1871_v56  ;;  %v1873_v58 = vpop.eup %1872 }
 0x5a6   :  { %1892 = vrcp.f32 %v1325_v57  ;;  %v1875_v2 = vpop.eup %1874  ;;  %v1444_v30 = vmul.f32 %v1940_v29, %v1873_v58 }
 0x5a7   :  { %1894 = vrcp.f32 %v1373_v45  ;;  %v1877_v3 = vpop.eup %1876  ;;  %v1442_v9 = vmul.f32 %v1934_v62, %v1875_v2 }
 0x5a8   :  { %v1445_v37 = vmul.f32 %v1943_v36, %v1877_v3 }
 0x5a9   :  { %v1879_v4 = vpop.eup %1878 }
 0x5aa   :  { %v1443_v22 = vmul.f32 %v1937_v1, %v1879_v4 }
 0x5ad   :  { %v1881_v6 = vpop.eup %1880 }
 0x5ae   :  { %v1883_v7 = vpop.eup %1882  ;;  %v1338_v11 = vmul.f32 %v1932_v47, %v1881_v6 }
 0x5af   :  { %v1885_v8 = vpop.eup %1884  ;;  %v1386_v10 = vmul.f32 %v1933_v5, %v1883_v7 }
 0x5b0   :  { %v1887_v12 = vpop.eup %1886  ;;  %v1339_v18 = vmul.f32 %v1935_v14, %v1885_v8 }
 0x5b1   :  { %v1889_v13 = vpop.eup %1888  ;;  %v1394_v63 = vadd.f32 %v1386_v10, %v1338_v11  ;;  %v1387_v20 = vmul.f32 %v1936_v19, %v1887_v12 }
 0x5b2   :  { %v1891_v21 = vpop.eup %1890  ;;  %v1340_v26 = vmul.f32 %v1938_v25, %v1889_v13 }
 0x5b3   :  { %v1893_v23 = vpop.eup %1892  ;;  %v1450_v24 = vadd.f32 %v1442_v9, %v1394_v63  ;;  %v1395_v49 = vadd.f32 %v1387_v20, %v1339_v18  ;;  %v1388_v15 = vmul.f32 %v1939_v27, %v1891_v21 }
 0x5b4   :  { %v1895_v28 = vpop.eup %1894  ;;  %v1341_v33 = vmul.f32 %v1941_v32, %v1893_v23 }
 0x5b5   :  { %1458 = vst [vmem:[#allocation7 + $0x20] sm:$0xff] %v1450_v24  ;;  %v1451_v17 = vadd.f32 %v1443_v22, %v1395_v49  ;;  %v1396_v31 = vadd.f32 %v1388_v15, %v1340_v26  ;;  %v1389_v35 = vmul.f32 %v1942_v34, %v1895_v28 }
 0x5b7   :  { %1459 = vst [vmem:[#allocation7 + $0x28] sm:$0xff] %v1451_v17  ;;  %v1452_v38 = vadd.f32 %v1444_v30, %v1396_v31  ;;  %v1397_v60 = vadd.f32 %v1389_v35, %v1341_v33 }
 0x5b9   :  { %1460 = vst [vmem:[#allocation7 + $0x30] sm:$0xff] %v1452_v38  ;;  %v1453_v39 = vadd.f32 %v1445_v37, %v1397_v60 }
 0x5bb   :  { %1461 = vst [vmem:[#allocation7 + $0x38] sm:$0xff] %v1453_v39 }
 0x5bc   :  { %1995 = shalt.err (!%p1992_p0)
}
 0x5bd   :  { %1473 = dma.vmem_to_hbm [thread:$0]  %s1468_s13, 1024, %s2473_s5, [#allocation4], %s2011_s21, %s2011_s21, %s2012_s22  }
 0x5be   :  { %2008 = dma.done.wait [#allocation4], 1024  }
 0x5bf   :  { %2009 = vsyncadd [#allocation4], 4294966272 }
 0x5c0   :  { %1477 = vsyncpa [#allocation3], 1 }
 0x5c1   :  { %1478 = vsyncpa [#allocation6], 1 }
 0x5c2   :  { %1479 = vsyncpa [#allocation4], 1 }

</bundles_post_ra>
